<compile_context>
chip_gen: v7x
topology: tpu7x:2x2x1
jax: 0.10.0
libtpu: 0.0.40
codegen_flags: <defaults>
</compile_context>

<pallas_src>
import jax
import jax.numpy as jnp
from jax import lax
from jax.experimental import pallas as pl
from jax.experimental.pallas import tpu as pltpu

KERNEL_SIZE = 3
STRIDE = 1
L_IN = 358
L_OUT = (L_IN - (KERNEL_SIZE - 1)) // STRIDE  # 356  (== self.layerval)

MAX_TN = 4096          # rows per grid step (multiple of 128)
MIN_TN = 128
TARGET_STEPS = 8       # >= 4 steps per TensorCore on v7x (2 TCs share the grid)
VMEM_LIMIT_BYTES = 48 * 1024 * 1024


def _round_up(a: int, m: int) -> int:
    return ((a + m - 1) // m) * m


def _pick_tn(n: int) -> int:
    """Largest tile that still leaves >= TARGET_STEPS grid steps (when N allows)."""
    tn = _round_up(pl.cdiv(n, TARGET_STEPS), 128)
    return int(max(MIN_TN, min(MAX_TN, tn)))


def net_kernel(x_ref, cw_ref, cb_ref, mwt_ref, mb_ref, o_ref):
    """Fused conv1d(k=3, s=1) + relu + Linear(356 -> 1) for one batch tile.

    x_ref  : (TN, L_IN)     VMEM  input rows (float dtype; upcast to f32)
    cw_ref : (KERNEL_SIZE,) SMEM  conv weight (out=1, in=1 squeezed)
    cb_ref : (1,)           SMEM  conv bias
    mwt_ref: (L_OUT, 1)     VMEM  mlp weight, pre-transposed (stationary rhs)
    mb_ref : (1,)           SMEM  mlp bias
    o_ref  : (1, TN)        VMEM  lane-dense output (batch on lanes)
    """
    f32 = jnp.float32
    # Conv1d as shifted multiply-adds (stride == 1); bias folded into tap 0.
    # Slice the ref per tap (instead of binding the full tile once) so at most
    # ~2 full-tile temporaries are live -> lower VMEM spill pressure.
    acc = cb_ref[0] + cw_ref[0] * x_ref[:, 0:L_OUT].astype(f32)
    for k in range(1, KERNEL_SIZE):
        acc = acc + cw_ref[k] * x_ref[:, k:k + L_OUT].astype(f32)
    y = jnp.maximum(acc, 0.0)                                   # (TN, L_OUT)

    # Linear(L_OUT -> 1) on the MXU: y (TN, K) @ w^T (K, 1) -> (TN, 1).
    # K is already minor on y and the stationary weight operand is tiny, so no
    # (TN, L_OUT) activation transpose is pushed through the XLU.
    out = lax.dot_general(
        y, mwt_ref[...],
        dimension_numbers=(((1,), (0,)), ((), ())),
        preferred_element_type=jnp.float32,
    )                                                           # (TN, 1)

    # Small (TN,1) -> (1,TN) shuffle keeps the HBM writeback lane-dense.
    o_ref[...] = (jnp.transpose(out) + mb_ref[0]).astype(o_ref.dtype)


def net_forward(x, conv_w, conv_b, mlp_w, mlp_b):
    """x: (N, 358, 1) float32/bfloat16 -> (N, 1) float32.

    conv_w: (KERNEL_SIZE,)  conv_b: (1,)   (nn.Conv1d(1, 1, 3) squeezed)
    mlp_w : (1, L_OUT)      mlp_b : (1,)   (nn.Linear(356, 1))
    """
    n = x.shape[0]
    # transpose(1,2) + channel squeeze is a pure reshape (channel dim is 1).
    x2 = jnp.reshape(x, (n, L_IN))
    # Tiny host-side transpose so the kernel's MXU rhs is already (L_OUT, 1).
    mlp_wt = jnp.reshape(mlp_w, (1, L_OUT)).T

    tn = _pick_tn(n)
    grid = (pl.cdiv(n, tn),)

    out = pl.pallas_call(
        net_kernel,
        out_shape=jax.ShapeDtypeStruct((1, n), jnp.float32),
        grid=grid,
        in_specs=[
            pl.BlockSpec((tn, L_IN), lambda i: (i, 0)),             # x tile
            pl.BlockSpec(memory_space=pltpu.MemorySpace.SMEM),      # conv w
            pl.BlockSpec(memory_space=pltpu.MemorySpace.SMEM),      # conv b
            pl.BlockSpec((L_OUT, 1), lambda i: (0, 0)),             # mlp w^T
            pl.BlockSpec(memory_space=pltpu.MemorySpace.SMEM),      # mlp b
        ],
        out_specs=pl.BlockSpec((1, tn), lambda i: (0, i)),
        compiler_params=pltpu.CompilerParams(
            dimension_semantics=("parallel",),
            vmem_limit_bytes=VMEM_LIMIT_BYTES,
        ),
        cost_estimate=pl.CostEstimate(
            flops=(2 * KERNEL_SIZE + 2) * n * L_OUT,
            transcendentals=0,
            bytes_accessed=n * L_IN * x2.dtype.itemsize + n * 4
            + (L_OUT + KERNEL_SIZE + 2) * 4,
        ),
    )(x2, conv_w, conv_b, mlp_wt, mlp_b)

    # (1, N) lane-dense -> (N, 1)
    return jnp.reshape(out, (n, 1))


def net_forward_ref(x, conv_w, conv_b, mlp_w, mlp_b):
    """Pure-JAX reference for verification."""
    n = x.shape[0]
    xx = jnp.reshape(x, (n, L_IN)).astype(jnp.float32)
    acc = conv_b[0] + sum(conv_w[k] * xx[:, k:k + L_OUT]
                          for k in range(KERNEL_SIZE))
    y = jnp.maximum(acc, 0.0)
    return y @ mlp_w.T + mlp_b[0]


if __name__ == "__main__":
    key = jax.random.PRNGKey(0)
    k_x, k_cw, k_cb, k_mw, k_mb = jax.random.split(key, 5)

    # Parameter shapes follow nn.Conv1d(1, 1, 3) / nn.Linear(356, 1).
    conv_w = jax.random.normal(k_cw, (KERNEL_SIZE,), dtype=jnp.float32) * 0.1
    conv_b = jax.random.normal(k_cb, (1,), dtype=jnp.float32) * 0.1
    mlp_w = jax.random.normal(k_mw, (1, L_OUT), dtype=jnp.float32) * 0.05
    mlp_b = jax.random.normal(k_mb, (1,), dtype=jnp.float32) * 0.05

    # Small batch, matching the module's (N, 358, 1) input signature.
    N = 2
    x = jax.random.normal(k_x, (N, L_IN, 1), dtype=jnp.float32)
    out = jax.block_until_ready(net_forward(x, conv_w, conv_b, mlp_w, mlp_b))
    ref = net_forward_ref(x, conv_w, conv_b, mlp_w, mlp_b)
    assert out.shape == (N, 1), out.shape
    assert jnp.allclose(out, ref, atol=1e-4, rtol=1e-4), (out, ref)

    # Non-multiple-of-128 batch: exercises the padding-free wrapper, a
    # multi-step grid, and the masked partial final block.
    N2 = 300
    x_big = jax.random.normal(k_x, (N2, L_IN, 1), dtype=jnp.float32)
    out2 = jax.block_until_ready(
        net_forward(x_big, conv_w, conv_b, mlp_w, mlp_b))
    ref2 = net_forward_ref(x_big, conv_w, conv_b, mlp_w, mlp_b)
    assert out2.shape == (N2, 1), out2.shape
    assert jnp.allclose(out2, ref2, atol=2e-3, rtol=2e-3), float(
        jnp.max(jnp.abs(out2 - ref2)))

    print("KERNEL_OK")
</pallas_src>

<mosaic_0001>
module attributes {stable_mosaic.version = 11 : i64} {
  func.func @net_kernel(%arg0: i32, %arg1: memref<128x358xf32, #tpu.memory_space<vmem>>, %arg2: memref<3xf32, #tpu.memory_space<smem>>, %arg3: memref<1xf32, #tpu.memory_space<smem>>, %arg4: memref<356x1xf32, #tpu.memory_space<vmem>>, %arg5: memref<1xf32, #tpu.memory_space<smem>>, %arg6: memref<1x128xf32, #tpu.memory_space<vmem>>) attributes {dimension_semantics = [#tpu.dimension_semantics<parallel>], iteration_bounds = array<i64: 1>, scalar_prefetch = 0 : i64, scratch_operands = 0 : i64, tpu.core_type = #tpu.core_type<tc>, window_params = [{transform_indices = @transform_0, window_bounds = array<i64: 128, 358>}, {transform_indices = @transform_1, window_bounds = array<i64: 3>}, {transform_indices = @transform_2, window_bounds = array<i64: 1>}, {pipeline_mode = #tpu.pipeline_mode<synchronous>, transform_indices = @transform_3, window_bounds = array<i64: 356, 1>}, {transform_indices = @transform_4, window_bounds = array<i64: 1>}, {transform_indices = @transform_5, window_bounds = array<i64: 1, 128>}]} {
    %c0 = arith.constant 0 : index
    %0 = memref.load %arg3[%c0] : memref<1xf32, #tpu.memory_space<smem>>
    %c0_0 = arith.constant 0 : index
    %1 = memref.load %arg2[%c0_0] : memref<3xf32, #tpu.memory_space<smem>>
    %c0_1 = arith.constant 0 : index
    %c0_2 = arith.constant 0 : index
    %2 = vector.load %arg1[%c0_1, %c0_2] : memref<128x358xf32, #tpu.memory_space<vmem>>, vector<128x356xf32>
    %3 = vector.broadcast %1 : f32 to vector<128x356xf32>
    %4 = arith.mulf %3, %2 : vector<128x356xf32>
    %5 = vector.broadcast %0 : f32 to vector<128x356xf32>
    %6 = arith.addf %5, %4 : vector<128x356xf32>
    %c1 = arith.constant 1 : index
    %7 = memref.load %arg2[%c1] : memref<3xf32, #tpu.memory_space<smem>>
    %c0_3 = arith.constant 0 : index
    %c1_4 = arith.constant 1 : index
    %8 = vector.load %arg1[%c0_3, %c1_4] : memref<128x358xf32, #tpu.memory_space<vmem>>, vector<128x356xf32>
    %9 = vector.broadcast %7 : f32 to vector<128x356xf32>
    %10 = arith.mulf %9, %8 : vector<128x356xf32>
    %11 = arith.addf %6, %10 : vector<128x356xf32>
    %c2 = arith.constant 2 : index
    %12 = memref.load %arg2[%c2] : memref<3xf32, #tpu.memory_space<smem>>
    %c0_5 = arith.constant 0 : index
    %c2_6 = arith.constant 2 : index
    %13 = vector.load %arg1[%c0_5, %c2_6] : memref<128x358xf32, #tpu.memory_space<vmem>>, vector<128x356xf32>
    %14 = vector.broadcast %12 : f32 to vector<128x356xf32>
    %15 = arith.mulf %14, %13 : vector<128x356xf32>
    %16 = arith.addf %11, %15 : vector<128x356xf32>
    %cst = arith.constant 0.000000e+00 : f32
    %17 = vector.broadcast %cst : f32 to vector<128x356xf32>
    %18 = arith.maximumf %16, %17 : vector<128x356xf32>
    %c0_7 = arith.constant 0 : index
    %c0_8 = arith.constant 0 : index
    %19 = vector.load %arg4[%c0_7, %c0_8] : memref<356x1xf32, #tpu.memory_space<vmem>>, vector<356x1xf32>
    %cst_9 = arith.constant dense<0.000000e+00> : vector<128x1xf32>
    %20 = tpu.matmul %18, %19, %cst_9 {dimension_numbers = #tpu.dot_dimension_numbers<[1], [0], [0], [1], [0, 0, 1, 1], [], []>} : vector<128x356xf32>, vector<356x1xf32>, vector<128x1xf32> -> vector<128x1xf32>
    %21 = tpu.transpose %20, [1, 0] : vector<128x1xf32> -> vector<1x128xf32>
    %c0_10 = arith.constant 0 : index
    %22 = memref.load %arg5[%c0_10] : memref<1xf32, #tpu.memory_space<smem>>
    %23 = vector.broadcast %22 : f32 to vector<1x128xf32>
    %24 = arith.addf %21, %23 : vector<1x128xf32>
    %c0_11 = arith.constant 0 : index
    %c0_12 = arith.constant 0 : index
    %25 = vector.load %arg6[%c0_11, %c0_12] : memref<1x128xf32, #tpu.memory_space<vmem>>, vector<1x128xf32>
    tpu.vector_store %arg6[%c0_11, %c0_12], %24 {strides = array<i32>} : memref<1x128xf32, #tpu.memory_space<vmem>>, vector<1x128xf32>,
    return
  }
  func.func @transform_0(%arg0: i32) -> (i32, i32) {
    %c0_i32 = arith.constant 0 : i32
    %c0_i32_0 = arith.constant 0 : i32
    return %arg0, %c0_i32 : i32, i32
  }
  func.func @transform_1(%arg0: i32) -> i32 {
    %c0_i32 = arith.constant 0 : i32
    %c0_i32_0 = arith.constant 0 : i32
    return %c0_i32 : i32
  }
  func.func @transform_2(%arg0: i32) -> i32 {
    %c0_i32 = arith.constant 0 : i32
    %c0_i32_0 = arith.constant 0 : i32
    return %c0_i32 : i32
  }
  func.func @transform_3(%arg0: i32) -> (i32, i32) {
    %c0_i32 = arith.constant 0 : i32
    %c0_i32_0 = arith.constant 0 : i32
    %c0_i32_1 = arith.constant 0 : i32
    return %c0_i32, %c0_i32_0 : i32, i32
  }
  func.func @transform_4(%arg0: i32) -> i32 {
    %c0_i32 = arith.constant 0 : i32
    %c0_i32_0 = arith.constant 0 : i32
    return %c0_i32 : i32
  }
  func.func @transform_5(%arg0: i32) -> (i32, i32) {
    %c0_i32 = arith.constant 0 : i32
    %c0_i32_0 = arith.constant 0 : i32
    return %c0_i32, %arg0 : i32, i32
  }
}

</mosaic_0001>

<bundles_post_ra>
// kernel: tpu_custom_call.1
= control target key start
LH: loop header
LB: loop body
LE: loop exit
PB: predicated region body
PF: predicated region fallthrough
CT: control target
= control target key end

     0   :  { %12 = vsyncpa [#allocation6], 0  ;;  %s3979_s0 = inlined_call_operand.vmem [shape: f32[2,358], index: 0, kind: input, shape index: {}]   ;;  %s3980_s1 = inlined_call_operand.vmem [shape: f32[3], index: 1, kind: input, shape index: {}]   ;;  %s3981_s2 = inlined_call_operand.<no memory space> [shape: f32[1], index: 2, kind: input, shape index: {}]   ;;  %s3982_s3 = inlined_call_operand.vmem [shape: f32[356,1], index: 3, kind: input, shape index: {}]   ;;  %s3983_s4 = inlined_call_operand.<no memory space> [shape: f32[1], index: 4, kind: input, shape index: {}]   ;;  %s3984_s5 = inlined_call_operand.hbm [shape: f32[1,2], index: 5, kind: output, shape index: {}]  }
   0x1   :  { %13 = vsyncpa [#allocation5], 0  ;;  %s22_s20 = sshll.u32 %s3980_s1, 4  ;;  %s23_s20 = int_to_ptr.vmem [resolvable:$true] %s22_s20 }
   0x2   :  { %s2668_s21 = scalar_lea.vmem %s23_s20, 16  ;;  %p2673_p1 = scmp.lt.s32.totalorder %s23_s20, %s23_s20 }
   0x3   :  { %p2669_p0 = scmp.ne.s32.totalorder %s23_s20, %s2668_s21  ;;  %p2674_p2 = scmp.lt.s32.totalorder %s2668_s21, %s2668_s21 }
   0x5   :  { %p2675_p3 = por %p2674_p2, %p2673_p1 }
   0x7   :  { %p2676_p4 = pnand %p2675_p3, %p2669_p0 }
   0x9   :  { %2679 = shalt.err (!%p2676_p4)
}
   0xa   :  { %s2706_s22 = smov [#allocation4]  }
   0xb   :  { %25 = dma.vmem_to_smem %s23_s20, 16, %s2706_s22, [#allocation6]  }
   0xc   :  { %2702 = dma.done.wait [#allocation6], 16  }
   0xd   :  { %2703 = vsyncadd [#allocation6], 4294967280 }
   0xe   :  { %35 = sfence }
   0xf   :  { %s2405_s23 = sld [smem:[#allocation4 + $0x1]]  ;;  %v1342_v0 = vld [vmem:[%s3982_s3 + $0x80] sm:$0xff]  ;;  %s2406_s26 = sld [smem:[#allocation4 + $0x2]]  ;;  %v1343_v1 = vld [vmem:[%s3982_s3 + $0x88] sm:$0xff]  ;;  %v2765_v6 = vld [vmem:[%s3979_s0 + $0x12] sm:$0x3f] }
  0x10   :  { %v2583_v2 = vpack.c.bf16 %v1343_v1, %v1342_v0  ;;  %v2753_v3 = vld [vmem:[%s3979_s0 + $0xc] sm:$0x3f]  ;;  %v2758_v4 = vld [vmem:[%s3979_s0] sm:$0x3f]  ;;  %v2770_v7 = vld [vmem:[%s3979_s0 + $0x6] sm:$0x3f] }
  0x11   :  { %s2707_s11 = smov 127   ;;  %s2708_s12 = smov 126   ;;  %v2799_v17 = vld [vmem:[%s3979_s0 + $0x1e] sm:$0x3f]  ;;  %v2804_v18 = vld [vmem:[%s3979_s0 + $0x18] sm:$0x3f] }
  0x12   :  { %2584 = vmatprep.subr.bf16.mxu0 %v2583_v2  ;;  %v1326_v19 = vld [vmem:[%s3982_s3] sm:$0xff]  ;;  %v1327_v20 = vld [vmem:[%s3982_s3 + $0x8] sm:$0xff]  ;;  %v1344_v21 = vld [vmem:[%s3982_s3 + $0x90] sm:$0xff]  ;;  %vm2060_vm0 = vcmask 1043456   ;;  %vm554_vm1 = vcmask 1039360   ;;  %vm1069_vm2 = vcmask 1031168  }
  0x13   :  { %v1345_v22 = vld [vmem:[%s3982_s3 + $0x98] sm:$0xff]  ;;  %v2827_v25 = vld [vmem:[%s3979_s0 + $0x2a] sm:$0x3f]  ;;  %v2832_v26 = vld [vmem:[%s3979_s0 + $0x24] sm:$0x3f]  ;;  %v2585_v27 = vpack.c.bf16 %v1327_v20, %v1326_v19  ;;  %vm2027_vm3 = vcmask 818176  }
  0x14   :  { %v2587_v28 = vpack.c.bf16 %v1345_v22, %v1344_v21  ;;  %v1328_v29 = vld [vmem:[%s3982_s3 + $0x10] sm:$0xff]  ;;  %v1329_v30 = vld [vmem:[%s3982_s3 + $0x18] sm:$0xff]  ;;  %v1346_v31 = vld [vmem:[%s3982_s3 + $0xa0] sm:$0xff]  ;;  %s2710_s16 = smov [#allocation7]  }
  0x15   :  { %v2760_v5 = vstv %s2405_s23  ;;  %v2782_v12 = vstv %s2406_s26  ;;  %v1347_v32 = vld [vmem:[%s3982_s3 + $0xa8] sm:$0xff]  ;;  %2586 = vmatpush3.bf16.msra.mxu0 %v2585_v27  ;;  %v2589_v35 = vpack.c.bf16 %v1329_v30, %v1328_v29  ;;  %v1330_v36 = vld [vmem:[%s3982_s3 + $0x20] sm:$0xff]  ;;  %s37_s26 = sld [smem:[#allocation4]]  ;;  %s2396_s17 = sshll.u32 %s2710_s16, 4  ;;  %s2397_s17 = int_to_ptr.vmem [resolvable:$true] %s2396_s17 }
  0x16   :  { %v236_v8 = vmul.f32 %v2760_v5, %v2753_v3  ;;  %v234_v9 = vmul.f32 %v2760_v5, %v2758_v4  ;;  %v237_v10 = vmul.f32 %v2760_v5, %v2765_v6  ;;  %v235_v11 = vmul.f32 %v2760_v5, %v2770_v7  ;;  %2588 = vmatprep.subr.bf16.mxu0 %v2587_v28  ;;  %v1331_v38 = vld [vmem:[%s3982_s3 + $0x28] sm:$0xff]  ;;  %v1358_v39 = vld [vmem:[%s3982_s3 + $0x100] sm:$0xff]  ;;  %v1348_v41 = vld [vmem:[%s3982_s3 + $0xb0] sm:$0xff]  ;;  %s2680_s18 = scalar_lea.vmem %s2397_s17, 16  ;;  %s2684_s19 = scalar_lea.vmem %s2397_s17, 32 }
  0x17   :  { %v750_v13 = vmul.f32 %v2782_v12, %v2770_v7  ;;  %v749_v14 = vmul.f32 %v2782_v12, %v2758_v4  ;;  %v752_v15 = vmul.f32 %v2782_v12, %v2765_v6  ;;  %v751_v16 = vmul.f32 %v2782_v12, %v2753_v3  ;;  %v1359_v40 = vld [vmem:[%s3982_s3 + $0x108] sm:$0xff]  ;;  %v1349_v42 = vld [vmem:[%s3982_s3 + $0xb8] sm:$0xff]  ;;  %v1360_v45 = vld [vmem:[%s3982_s3 + $0x110] sm:$0xff]  ;;  %p2681_p5 = scmp.ne.s32.totalorder %s2397_s17, %s2680_s18  ;;  %p2685_p6 = scmp.lt.s32.totalorder %s2397_s17, %s2397_s17 }
  0x18   :  { %366 = vrot.lane.b32.xlu1 %v236_v8, %s2707_s11  ;;  %362 = vrot.lane.b32.xlu0 %v234_v9, %s2707_s11  ;;  %v239_v23 = vmul.f32 %v2760_v5, %v2799_v17  ;;  %v238_v24 = vmul.f32 %v2760_v5, %v2804_v18  ;;  %v241_v33 = vmul.f32 %v2760_v5, %v2827_v25  ;;  %v1361_v46 = vld [vmem:[%s3982_s3 + $0x118] sm:$0xff]  ;;  %v1332_v50 = vld [vmem:[%s3982_s3 + $0x30] sm:$0xff]  ;;  %p2686_p7 = scmp.lt.s32.totalorder %s2684_s19, %s2680_s18 }
  0x19   :  { %v240_v34 = vmul.f32 %v2760_v5, %v2832_v26  ;;  %v2591_v37 = vpack.c.bf16 %v1347_v32, %v1346_v31  ;;  %v754_v43 = vmul.f32 %v2782_v12, %v2799_v17  ;;  %v753_v44 = vmul.f32 %v2782_v12, %v2804_v18  ;;  %2590 = vmatpush3.bf16.msra.mxu0 %v2589_v35  ;;  %v1333_v51 = vld [vmem:[%s3982_s3 + $0x38] sm:$0xff]  ;;  %v1350_v52 = vld [vmem:[%s3982_s3 + $0xc0] sm:$0xff]  ;;  %v1351_v53 = vld [vmem:[%s3982_s3 + $0xc8] sm:$0xff] }
  0x1a   :  { %v2593_v47 = vpack.c.bf16 %v1331_v38, %v1330_v36  ;;  %v2615_v48 = vpack.c.bf16 %v1359_v40, %v1358_v39  ;;  %v2595_v49 = vpack.c.bf16 %v1349_v42, %v1348_v41  ;;  %v2619_v54 = vpack.c.bf16 %v1361_v46, %v1360_v45  ;;  %v1362_v55 = vld [vmem:[%s3982_s3 + $0x120] sm:$0xff]  ;;  %v1363_v56 = vld [vmem:[%s3982_s3 + $0x128] sm:$0xff]  ;;  %v2909_v59 = vld [vmem:[%s3979_s0 + $0x36] sm:$0x3f]  ;;  %p2687_p8 = por %p2686_p7, %p2685_p6 }
  0x1b   :  { %2592 = vmatprep.subr.bf16.mxu0 %v2591_v37  ;;  %v756_v57 = vmul.f32 %v2782_v12, %v2827_v25  ;;  %v755_v58 = vmul.f32 %v2782_v12, %v2832_v26  ;;  %v2914_v60 = vld [vmem:[%s3979_s0 + $0x30] sm:$0x3f]  ;;  %v2597_v61 = vpack.c.bf16 %v1333_v51, %v1332_v50  ;;  %v2599_v62 = vpack.c.bf16 %v1351_v53, %v1350_v52  ;;  %v1334_v63 = vld [vmem:[%s3982_s3 + $0x40] sm:$0xff]  ;;  %v1335_v0 = vld [vmem:[%s3982_s3 + $0x48] sm:$0xff] }
  0x1c   :  { %368 = vrot.lane.b32.xlu1 %v237_v10, %s2707_s11  ;;  %364 = vrot.lane.b32.xlu0 %v235_v11, %s2707_s11  ;;  %v1352_v1 = vld [vmem:[%s3982_s3 + $0xd0] sm:$0xff]  ;;  %v2623_v2 = vpack.c.bf16 %v1363_v56, %v1362_v55  ;;  %v1353_v8 = vld [vmem:[%s3982_s3 + $0xd8] sm:$0xff]  ;;  %v243_v11 = vmul.f32 %v2760_v5, %v2909_v59  ;;  %v758_v40 = vmul.f32 %v2782_v12, %v2909_v59  ;;  %p2688_p9 = pnand %p2687_p8, %p2681_p5 }
  0x1d   :  { %2616 = vmatprep.subr.bf16.mxu1 %v2615_v48  ;;  %2594 = vmatpush3.bf16.msra.mxu0 %v2593_v47  ;;  %v1364_v9 = vld [vmem:[%s3982_s3 + $0x130] sm:$0xff]  ;;  %v1365_v10 = vld [vmem:[%s3982_s3 + $0x138] sm:$0xff]  ;;  %v2603_v19 = vpack.c.bf16 %v1353_v8, %v1352_v1  ;;  %v1354_v22 = vld [vmem:[%s3982_s3 + $0xe0] sm:$0xff]  ;;  %v757_v41 = vmul.f32 %v2782_v12, %v2914_v60 }
  0x1e   :  { %2618 = vmatpush3.bf16.msra.mxu1 %v2615_v48  ;;  %2596 = vmatprep.subr.bf16.mxu0 %v2595_v49  ;;  %v1336_v20 = vld [vmem:[%s3982_s3 + $0x50] sm:$0xff]  ;;  %v1337_v21 = vld [vmem:[%s3982_s3 + $0x58] sm:$0xff]  ;;  %v1366_v27 = vld [vmem:[%s3982_s3 + $0x140] sm:$0xff] }
  0x1f   :  { %2620 = vmatprep.subr.bf16.mxu1 %v2619_v54  ;;  %v1367_v28 = vld [vmem:[%s3982_s3 + $0x148] sm:$0xff]  ;;  %v2605_v31 = vpack.c.bf16 %v1337_v21, %v1336_v20  ;;  %v1356_v35 = vld [vmem:[%s3982_s3 + $0xf0] sm:$0xff]  ;;  %v1357_v37 = vld [vmem:[%s3982_s3 + $0xf8] sm:$0xff] }
  0x20   :  { %879 = vrot.lane.b32.xlu1 %v750_v13, %s2708_s12  ;;  %877 = vrot.lane.b32.xlu0 %v749_v14, %s2708_s12  ;;  %v242_v13 = vmul.f32 %v2760_v5, %v2914_v60  ;;  %v2943_v14 = vld [vmem:[%s3979_s0 + $0x42] sm:$0x3f]  ;;  %v2631_v36 = vpack.c.bf16 %v1367_v28, %v1366_v27  ;;  %v1368_v38 = vld [vmem:[%s3982_s3 + $0x150] sm:$0xff] }
  0x21   :  { %2598 = vmatpush3.bf16.msra.mxu0 %v2597_v61  ;;  %v245_v29 = vmul.f32 %v2760_v5, %v2943_v14  ;;  %v1369_v39 = vld [vmem:[%s3982_s3 + $0x158] sm:$0xff]  ;;  %v760_v47 = vmul.f32 %v2782_v12, %v2943_v14  ;;  %v3013_v49 = vld [vmem:[%s3979_s0 + $0x4e] sm:$0x3f]  ;;  %v3018_v50 = vld [vmem:[%s3979_s0 + $0x48] sm:$0x3f] }
  0x22   :  { %2622 = vmatpush3.bf16.msra.mxu1 %v2619_v54  ;;  %2600 = vmatprep.subr.bf16.mxu0 %v2599_v62  ;;  %v1341_v45 = vld [vmem:[%s3982_s3 + $0x78] sm:$0xff]  ;;  %v2635_v46 = vpack.c.bf16 %v1369_v39, %v1368_v38  ;;  %v1370_v52 = vld [vmem:[%s3982_s3 + $0x160] sm:$0xf]  ;;  %v247_v53 = vmul.f32 %v2760_v5, %v3013_v49  ;;  %v246_v54 = vmul.f32 %v2760_v5, %v3018_v50  ;;  %v3060_v1 = vld [vmem:[%s3979_s0 + $0x66] sm:$0x3f] }
  0x23   :  { %2624 = vmatprep.subr.bf16.mxu1 %v2623_v2  ;;  %v3032_v55 = vld [vmem:[%s3979_s0 + $0x5a] sm:$0x3f]  ;;  %v3037_v56 = vld [vmem:[%s3979_s0 + $0x54] sm:$0x3f]  ;;  %v762_v61 = vmul.f32 %v2782_v12, %v3013_v49  ;;  %v761_v62 = vmul.f32 %v2782_v12, %v3018_v50  ;;  %v251_v8 = vmul.f32 %v2760_v5, %v3060_v1 }
  0x24   :  { %883 = vrot.lane.b32.xlu1 %v752_v15, %s2708_s12  ;;  %881 = vrot.lane.b32.xlu0 %v751_v16, %s2708_s12  ;;  %v2948_v15 = vld [vmem:[%s3979_s0 + $0x3c] sm:$0x3f]  ;;  %v2601_v16 = vpack.c.bf16 %v1335_v0, %v1334_v63  ;;  %v764_v63 = vmul.f32 %v2782_v12, %v3032_v55  ;;  %v763_v0 = vmul.f32 %v2782_v12, %v3037_v56  ;;  %v3153_v38 = vld [vmem:[%s3979_s0 + $0x90] sm:$0x3f] }
  0x25   :  { %v244_v30 = vmul.f32 %v2760_v5, %v2948_v15  ;;  %v759_v48 = vmul.f32 %v2782_v12, %v2948_v15 }
  0x26   :  { %2602 = vmatpush3.bf16.msra.mxu0 %v2601_v16  ;;  %2626 = vmatpush3.bf16.msra.mxu1 %v2623_v2  ;;  %v3065_v2 = vld [vmem:[%s3979_s0 + $0x60] sm:$0x3f] }
  0x27   :  { %2604 = vmatprep.subr.bf16.mxu0 %v2603_v19  ;;  %v766_v19 = vmul.f32 %v2782_v12, %v3060_v1  ;;  %v765_v20 = vmul.f32 %v2782_v12, %v3065_v2 }
  0x28   :  { %372 = vrot.lane.b32.xlu1 %v239_v23, %s2707_s11  ;;  %370 = vrot.lane.b32.xlu0 %v238_v24, %s2707_s11  ;;  %v2627_v23 = vpack.c.bf16 %v1365_v10, %v1364_v9  ;;  %v1355_v24 = vld [vmem:[%s3982_s3 + $0xe8] sm:$0xff]  ;;  %v250_v9 = vmul.f32 %v2760_v5, %v3065_v2  ;;  %v3076_v10 = vld [vmem:[%s3979_s0 + $0x72] sm:$0x3f] }
  0x29   :  { %v2607_v32 = vpack.c.bf16 %v1355_v24, %v1354_v22  ;;  %v768_v21 = vmul.f32 %v2782_v12, %v3076_v10  ;;  %v3109_v24 = vld [vmem:[%s3979_s0 + $0x78] sm:$0x3f] }
  0x2a   :  { %2628 = vmatprep.subr.bf16.mxu1 %v2627_v23  ;;  %2606 = vmatpush3.bf16.msra.mxu0 %v2605_v31  ;;  %v254_v28 = vmul.f32 %v2760_v5, %v3109_v24 }
  0x2b   :  { %2630 = vmatpush3.bf16.msra.mxu1 %v2627_v23  ;;  %2608 = vmatprep.subr.bf16.mxu0 %v2607_v32  ;;  %v3104_v23 = vld [vmem:[%s3979_s0 + $0x7e] sm:$0x3f] }
  0x2c   :  { %376 = vrot.lane.b32.xlu1 %v241_v33, %s2707_s11  ;;  %374 = vrot.lane.b32.xlu0 %v240_v34, %s2707_s11  ;;  %v1338_v33 = vld [vmem:[%s3982_s3 + $0x60] sm:$0xff]  ;;  %v1339_v34 = vld [vmem:[%s3982_s3 + $0x68] sm:$0xff]  ;;  %v255_v27 = vmul.f32 %v2760_v5, %v3104_v23 }
  0x2d   :  { %v2609_v42 = vpack.c.bf16 %v1339_v34, %v1338_v33  ;;  %2632 = vmatprep.subr.bf16.mxu1 %v2631_v36  ;;  %v770_v33 = vmul.f32 %v2782_v12, %v3104_v23  ;;  %v769_v34 = vmul.f32 %v2782_v12, %v3109_v24 }
  0x2f   :  { %2610 = vmatpush3.bf16.msra.mxu0 %v2609_v42  ;;  %2634 = vmatpush3.bf16.msra.mxu1 %v2631_v36  ;;  %v3169_v42 = vld [vmem:[%s3979_s0 + $0x9c] sm:$0x3f] }
  0x30   :  { %887 = vrot.lane.b32.xlu1 %v754_v43, %s2708_s12  ;;  %885 = vrot.lane.b32.xlu0 %v753_v44, %s2708_s12  ;;  %v2611_v43 = vpack.c.bf16 %v1357_v37, %v1356_v35  ;;  %v1340_v44 = vld [vmem:[%s3982_s3 + $0x70] sm:$0xff] }
  0x31   :  { %v2613_v51 = vpack.c.bf16 %v1341_v45, %v1340_v44  ;;  %2636 = vmatprep.subr.bf16.mxu1 %v2635_v46  ;;  %v3148_v37 = vld [vmem:[%s3979_s0 + $0x96] sm:$0x3f]  ;;  %v260_v44 = vmul.f32 %v2760_v5, %v3169_v42 }
  0x32   :  { %2612 = vmatprep.subr.bf16.mxu0 %v2611_v43  ;;  %v259_v39 = vmul.f32 %v2760_v5, %v3148_v37  ;;  %v774_v45 = vmul.f32 %v2782_v12, %v3148_v37 }
  0x33   :  { %2614 = vmatpush3.bf16.msra.mxu0 %v2613_v51  ;;  %2638 = vmatpush3.bf16.msra.mxu1 %v2635_v46  ;;  %v773_v46 = vmul.f32 %v2782_v12, %v3153_v38  ;;  %v67_v51 = vld [vmem:[%s3979_s0 + $0xae] sm:$0x3f] }
  0x34   :  { %891 = vrot.lane.b32.xlu1 %v756_v57, %s2708_s12  ;;  %889 = vrot.lane.b32.xlu0 %v755_v58, %s2708_s12  ;;  %v249_v57 = vmul.f32 %v2760_v5, %v3032_v55  ;;  %v248_v58 = vmul.f32 %v2760_v5, %v3037_v56 }
  0x35   :  { %2557 = vmatprep.subr.msk.mxu1 %vm2060_vm0, %v1370_v52 }
  0x37   :  { %2558 = vmatpush3.msk.msra.mxu1 %vm2060_vm0, %v1370_v52  ;;  %v66_v52 = vld [vmem:[%s3979_s0 + $0xa8] sm:$0x3f] }
  0x38   :  { %380 = vrot.lane.b32.xlu1 %v243_v11, %s2707_s11  ;;  %378 = vrot.lane.b32.xlu0 %v242_v13, %s2707_s11  ;;  %v3081_v11 = vld [vmem:[%s3979_s0 + $0x6c] sm:$0x3f]  ;;  %v253_v13 = vmul.f32 %v2760_v5, %v3076_v10 }
  0x39   :  { %v252_v16 = vmul.f32 %v2760_v5, %v3081_v11  ;;  %v767_v22 = vmul.f32 %v2782_v12, %v3081_v11 }
  0x3c   :  { %384 = vrot.lane.b32.xlu1 %v245_v29, %s2707_s11  ;;  %382 = vrot.lane.b32.xlu0 %v244_v30, %s2707_s11  ;;  %v3120_v29 = vld [vmem:[%s3979_s0 + $0x8a] sm:$0x3f]  ;;  %v3125_v30 = vld [vmem:[%s3979_s0 + $0x84] sm:$0x3f] }
  0x3d   :  { %v257_v31 = vmul.f32 %v2760_v5, %v3120_v29  ;;  %v256_v32 = vmul.f32 %v2760_v5, %v3125_v30  ;;  %v772_v35 = vmul.f32 %v2782_v12, %v3120_v29  ;;  %v771_v36 = vmul.f32 %v2782_v12, %v3125_v30 }
  0x40   :  { %895 = vrot.lane.b32.xlu1 %v758_v40, %s2708_s12  ;;  %893 = vrot.lane.b32.xlu0 %v757_v41, %s2708_s12  ;;  %v258_v40 = vmul.f32 %v2760_v5, %v3153_v38  ;;  %v3164_v41 = vld [vmem:[%s3979_s0 + $0xa2] sm:$0x3f] }
  0x41   :  { %v261_v43 = vmul.f32 %v2760_v5, %v3164_v41 }
  0x44   :  { %899 = vrot.lane.b32.xlu1 %v760_v47, %s2708_s12  ;;  %897 = vrot.lane.b32.xlu0 %v759_v48, %s2708_s12  ;;  %v776_v47 = vmul.f32 %v2782_v12, %v3164_v41  ;;  %v775_v48 = vmul.f32 %v2782_v12, %v3169_v42 }
  0x48   :  { %388 = vrot.lane.b32.xlu1 %v247_v53, %s2707_s11  ;;  %386 = vrot.lane.b32.xlu0 %v246_v54, %s2707_s11  ;;  %v263_v53 = vmul.f32 %v2760_v5, %v67_v51  ;;  %v262_v54 = vmul.f32 %v2760_v5, %v66_v52 }
  0x4c   :  { %392 = vrot.lane.b32.xlu1 %v249_v57, %s2707_s11  ;;  %390 = vrot.lane.b32.xlu0 %v248_v58, %s2707_s11  ;;  %v69_v57 = vld [vmem:[%s3979_s0 + $0xba] sm:$0x3f]  ;;  %v68_v58 = vld [vmem:[%s3979_s0 + $0xb4] sm:$0x3f] }
  0x50   :  { %903 = vrot.lane.b32.xlu1 %v762_v61, %s2708_s12  ;;  %901 = vrot.lane.b32.xlu0 %v761_v62, %s2708_s12  ;;  %v3205_v61 = vstv %s37_s26  ;;  %v265_v62 = vmul.f32 %v2760_v5, %v69_v57 }
  0x54   :  { %907 = vrot.lane.b32.xlu1 %v764_v63, %s2708_s12  ;;  %905 = vrot.lane.b32.xlu0 %v763_v0, %s2708_s12  ;;  %v264_v63 = vmul.f32 %v2760_v5, %v68_v58 }
  0x58   :  { %396 = vrot.lane.b32.xlu1 %v251_v8, %s2707_s11  ;;  %394 = vrot.lane.b32.xlu0 %v250_v9, %s2707_s11  ;;  %v103_v9 = vmul.f32 %v3205_v61, %v2758_v4  ;;  %v105_v4 = vmul.f32 %v3205_v61, %v2753_v3  ;;  %v71_v3 = vld [vmem:[%s3979_s0 + $0xc6] sm:$0x3f] }
  0x5c   :  { %400 = vrot.lane.b32.xlu1 %v253_v13, %s2707_s11  ;;  %398 = vrot.lane.b32.xlu0 %v252_v16, %s2707_s11  ;;  %v3216_v13 = vstv %s3981_s2  ;;  %v104_v16 = vmul.f32 %v3205_v61, %v2770_v7  ;;  %v780_v7 = vmul.f32 %v2782_v12, %v69_v57  ;;  %v1442_v57 = vlaneseq }
  0x60   :  { %911 = vrot.lane.b32.xlu1 %v766_v19, %s2708_s12  ;;  %909 = vrot.lane.b32.xlu0 %v765_v20, %s2708_s12  ;;  %v778_v19 = vmul.f32 %v2782_v12, %v67_v51  ;;  %v777_v20 = vmul.f32 %v2782_v12, %v66_v52 }
  0x64   :  { %915 = vrot.lane.b32.xlu1 %v768_v21, %s2708_s12  ;;  %913 = vrot.lane.b32.xlu0 %v767_v22, %s2708_s12 }
  0x68   :  { %404 = vrot.lane.b32.xlu1 %v255_v27, %s2707_s11  ;;  %402 = vrot.lane.b32.xlu0 %v254_v28, %s2707_s11  ;;  %v106_v27 = vmul.f32 %v3205_v61, %v2765_v6 }
  0x6c   :  { %408 = vrot.lane.b32.xlu1 %v257_v31, %s2707_s11  ;;  %406 = vrot.lane.b32.xlu0 %v256_v32, %s2707_s11  ;;  %v168_v31 = vadd.f32 %v3216_v13, %v103_v9 }
  0x70   :  { %919 = vrot.lane.b32.xlu1 %v770_v33, %s2708_s12  ;;  %917 = vrot.lane.b32.xlu0 %v769_v34, %s2708_s12  ;;  %v169_v33 = vadd.f32 %v3216_v13, %v104_v16  ;;  %v779_v34 = vmul.f32 %v2782_v12, %v68_v58 }
  0x74   :  { %923 = vrot.lane.b32.xlu1 %v772_v35, %s2708_s12  ;;  %921 = vrot.lane.b32.xlu0 %v771_v36, %s2708_s12 }
  0x78   :  { %412 = vrot.lane.b32.xlu1 %v259_v39, %s2707_s11  ;;  %410 = vrot.lane.b32.xlu0 %v258_v40, %s2707_s11  ;;  %v70_v40 = vld [vmem:[%s3979_s0 + $0xc0] sm:$0x3f] }
  0x7c   :  { %416 = vrot.lane.b32.xlu1 %v261_v43, %s2707_s11  ;;  %414 = vrot.lane.b32.xlu0 %v260_v44, %s2707_s11  ;;  %v170_v43 = vadd.f32 %v3216_v13, %v105_v4  ;;  %v171_v44 = vadd.f32 %v3216_v13, %v106_v27 }
  0x80   :  { %927 = vrot.lane.b32.xlu1 %v774_v45, %s2708_s12  ;;  %925 = vrot.lane.b32.xlu0 %v773_v46, %s2708_s12 }
  0x84   :  { %931 = vrot.lane.b32.xlu1 %v776_v47, %s2708_s12  ;;  %929 = vrot.lane.b32.xlu0 %v775_v48, %s2708_s12  ;;  %v2709_v47 = vmov 1983009808  }
  0x85   :  { %v1440_v48 = vunpack.c.l.s4 %v2709_v47  ;;  %v107_v47 = vmul.f32 %v3205_v61, %v2804_v18  ;;  %v781_v18 = vmul.f32 %v2782_v12, %v70_v40 }
  0x88   :  { %420 = vrot.lane.b32.xlu1 %v263_v53, %s2707_s11  ;;  %418 = vrot.lane.b32.xlu0 %v262_v54, %s2707_s11  ;;  %v267_v53 = vmul.f32 %v2760_v5, %v71_v3  ;;  %v73_v54 = vld [vmem:[%s3979_s0 + $0xd2] sm:$0x3f] }
  0x8a   :  { %v367_v0 = vpop.permute.xlu1 %366  ;;  %v363_v8 = vpop.permute.xlu0 %362 }
  0x8b   :  { %v490_v21 = vrot.slane %v363_v8, 2  ;;  %v492_v35 = vrot.slane %v367_v0, 2 }
  0x8c   :  { %424 = vrot.lane.b32.xlu1 %v265_v62, %s2707_s11  ;;  %422 = vrot.lane.b32.xlu0 %v264_v63, %s2707_s11  ;;  %v266_v63 = vmul.f32 %v2760_v5, %v70_v40 }
  0x8d   :  { %v555_v6 = vsel %vm554_vm1, %v363_v8, %v490_v21  ;;  %v72_v8 = vld [vmem:[%s3979_s0 + $0xcc] sm:$0x3f]  ;;  %v557_v9 = vsel %vm554_vm1, %v367_v0, %v492_v35 }
  0x8e   :  { %v369_v22 = vpop.permute.xlu1 %368  ;;  %v365_v28 = vpop.permute.xlu0 %364  ;;  %v683_v58 = vadd.f32 %v555_v6, %v168_v31  ;;  %v269_v31 = vmul.f32 %v2760_v5, %v73_v54  ;;  %v1443_v6 = vshrl.u32 %v1442_v57, 7 }
  0x8f   :  { %v491_v32 = vrot.slane %v365_v28, 2  ;;  %v493_v36 = vrot.slane %v369_v22, 2 }
  0x90   :  { %935 = vrot.lane.b32.xlu1 %v778_v19, %s2708_s12  ;;  %933 = vrot.lane.b32.xlu0 %v777_v20, %s2708_s12 }
  0x91   :  { %v556_v39 = vsel %vm554_vm1, %v365_v28, %v491_v32  ;;  %v558_v16 = vsel %vm554_vm1, %v369_v22, %v493_v36  ;;  %v1441_v32 = vunpack.c.0.s8 %v1440_v48 }
  0x92   :  { %v880_v45 = vpop.permute.xlu1 %879  ;;  %v878_v46 = vpop.permute.xlu0 %877  ;;  %v684_v62 = vadd.f32 %v556_v39, %v169_v33  ;;  %v685_v39 = vadd.f32 %v557_v9, %v170_v43  ;;  %v686_v0 = vadd.f32 %v558_v16, %v171_v44 }
  0x93   :  { %v1006_v51 = vrot.slane %v880_v45, 2  ;;  %v1005_v52 = vrot.slane %v878_v46, 2 }
  0x94   :  { %939 = vrot.lane.b32.xlu1 %v780_v7, %s2708_s12  ;;  %937 = vrot.lane.b32.xlu0 %v779_v34, %s2708_s12  ;;  %v268_v34 = vmul.f32 %v2760_v5, %v72_v8 }
  0x95   :  { %v1071_v19 = vsel %vm1069_vm2, %v880_v45, %v1006_v51  ;;  %v1070_v20 = vsel %vm1069_vm2, %v878_v46, %v1005_v52  ;;  %v108_v46 = vmul.f32 %v3205_v61, %v2799_v17  ;;  %v782_v17 = vmul.f32 %v2782_v12, %v71_v3 }
  0x96   :  { %v1199_v21 = vadd.f32 %v1071_v19, %v684_v62  ;;  %v1198_v4 = vadd.f32 %v1070_v20, %v683_v58  ;;  %v884_v27 = vpop.permute.xlu1 %883  ;;  %v882_v28 = vpop.permute.xlu0 %881  ;;  %v3270_v58 = vsub.s32 %v1441_v32, %v1443_v6  ;;  %v172_v20 = vadd.f32 %v3216_v13, %v107_v47 }
  0x97   :  { %v1008_v33 = vrot.slane %v884_v27, 2  ;;  %v1007_v7 = vrot.slane %v882_v28, 2  ;;  %v173_v9 = vadd.f32 %v3216_v13, %v108_v46  ;;  %v784_v32 = vmul.f32 %v2782_v12, %v73_v54 }
  0x98   :  { %v1263_v35 = vmax.f32 %v1199_v21, 0.0  ;;  %v1262_v22 = vmax.f32 %v1198_v4, 0.0  ;;  %428 = vrot.lane.b32.xlu1 %v267_v53, %s2707_s11  ;;  %426 = vrot.lane.b32.xlu0 %v266_v63, %s2707_s11  ;;  %v110_v53 = vmul.f32 %v3205_v61, %v2827_v25  ;;  %v109_v4 = vmul.f32 %v3205_v61, %v2832_v26 }
  0x99   :  { %v1073_v36 = vsel %vm1069_vm2, %v884_v27, %v1008_v33  ;;  %v1072_v45 = vsel %vm1069_vm2, %v882_v28, %v1007_v7  ;;  %v783_v3 = vmul.f32 %v2782_v12, %v72_v8  ;;  %v3287_v33 = vld [vmem:[%s3979_s0 + $0xde] sm:$0x3f]  ;;  %v74_v8 = vld [vmem:[%s3979_s0 + $0xd8] sm:$0x3f] }
  0x9a   :  { %v1201_v48 = vadd.f32 %v1073_v36, %v686_v0  ;;  %v1200_v51 = vadd.f32 %v1072_v45, %v685_v39  ;;  %v373_v43 = vpop.permute.xlu1 %372  ;;  %v371_v44 = vpop.permute.xlu0 %370  ;;  %v1435_v52 = vcombine.low %v1262_v22, %v1263_v35  ;;  %v1436_v57 = vcombine.high %v1262_v22, %v1263_v35 }
  0x9b   :  { %v495_v16 = vrot.slane %v373_v43, 2  ;;  %v494_v19 = vrot.slane %v371_v44, 2  ;;  %v174_v35 = vadd.f32 %v3216_v13, %v109_v4  ;;  %v271_v47 = vmul.f32 %v2760_v5, %v3287_v33 }
  0x9c   :  { %v1265_v62 = vmax.f32 %v1201_v48, 0.0  ;;  %v1264_v63 = vmax.f32 %v1200_v51, 0.0  ;;  %432 = vrot.lane.b32.xlu1 %v269_v31, %s2707_s11  ;;  %430 = vrot.lane.b32.xlu0 %v268_v34, %s2707_s11  ;;  %v175_v31 = vadd.f32 %v3216_v13, %v110_v53  ;;  %v1445_v40 = vrot.slane %v1435_v52, %v3270_v58 }
  0x9d   :  { %v1452_v34 = vrot.slane %v1436_v57, %v3270_v58  ;;  %v560_v6 = vsel %vm554_vm1, %v373_v43, %v495_v16  ;;  %v559_v39 = vsel %vm554_vm1, %v371_v44, %v494_v19  ;;  %v270_v57 = vmul.f32 %v2760_v5, %v74_v8 }
  0x9e   :  { %v377_v21 = vpop.permute.xlu1 %376  ;;  %v375_v25 = vpop.permute.xlu0 %374  ;;  %v1437_v27 = vcombine.low %v1264_v63, %v1265_v62  ;;  %v1438_v28 = vcombine.high %v1264_v63, %v1265_v62  ;;  %v688_v53 = vadd.f32 %v560_v6, %v173_v9  ;;  %v687_v43 = vadd.f32 %v559_v39, %v172_v20  ;;  %v77_v62 = vld [vmem:[%s3979_s0 + $0xea] sm:$0x3f]  ;;  %v76_v63 = vld [vmem:[%s3979_s0 + $0xe4] sm:$0x3f] }
  0x9f   :  { %v497_v7 = vrot.slane %v377_v21, 2  ;;  %v496_v0 = vrot.slane %v375_v25, 2 }
  0xa0   :  { %943 = vrot.lane.b32.xlu1 %v782_v17, %s2708_s12  ;;  %941 = vrot.lane.b32.xlu0 %v781_v18, %s2708_s12  ;;  %v1459_v26 = vrot.slane %v1437_v27, %v3270_v58  ;;  %v1466_v54 = vrot.slane %v1438_v28, %v3270_v58  ;;  %v273_v28 = vmul.f32 %v2760_v5, %v77_v62 }
  0xa1   :  { %v562_v44 = vsel %vm554_vm1, %v377_v21, %v497_v7  ;;  %v561_v17 = vsel %vm554_vm1, %v375_v25, %v496_v0 }
  0xa2   :  { %v888_v22 = vpop.permute.xlu1 %887  ;;  %v886_v36 = vpop.permute.xlu0 %885  ;;  %v1468_v45 = vcombine.high %v1445_v40, %v1459_v26  ;;  %v1469_v46 = vcombine.low %v1452_v34, %v1466_v54  ;;  %v1467_v52 = vcombine.low %v1445_v40, %v1459_v26  ;;  %v689_v25 = vadd.f32 %v561_v17, %v174_v35 }
  0xa3   :  { %v1010_v48 = vrot.slane %v888_v22, 2  ;;  %v1009_v51 = vrot.slane %v886_v36, 2  ;;  %v112_v54 = vmul.f32 %v3205_v61, %v2909_v59  ;;  %v111_v35 = vmul.f32 %v3205_v61, %v2914_v60 }
  0xa4   :  { %947 = vrot.lane.b32.xlu1 %v784_v32, %s2708_s12  ;;  %945 = vrot.lane.b32.xlu0 %v783_v3, %s2708_s12  ;;  %v272_v32 = vmul.f32 %v2760_v5, %v76_v63  ;;  %v690_v3 = vadd.f32 %v562_v44, %v175_v31  ;;  %v785_v59 = vmul.f32 %v2782_v12, %v74_v8 }
  0xa5   :  { %v1075_v18 = vsel %vm1069_vm2, %v888_v22, %v1010_v48  ;;  %v1074_v9 = vsel %vm1069_vm2, %v886_v36, %v1009_v51  ;;  %2128 = vmatprep.mubr.f32.mxu0 %v1468_v45  ;;  %2559 = vmatprep.mubr.msk.f32.mxu1 %vm2027_vm3, %v1469_v46  ;;  %v177_v60 = vadd.f32 %v3216_v13, %v112_v54 }
  0xa6   :  { %v1203_v16 = vadd.f32 %v1075_v18, %v688_v53  ;;  %v1202_v19 = vadd.f32 %v1074_v9, %v687_v43  ;;  %2129 = vmatmul.mubr.f32.vlgmr.msra.gmra.mrb[0].mxu0 %v1467_v52  ;;  %v892_v20 = vpop.permute.xlu1 %891  ;;  %v890_v21 = vpop.permute.xlu0 %889  ;;  %v114_v52 = vmul.f32 %v3205_v61, %v2943_v14  ;;  %v113_v17 = vmul.f32 %v3205_v61, %v2948_v15  ;;  %v3343_v14 = vld [vmem:[%s3979_s0 + $0xf6] sm:$0x3f] }
  0xa7   :  { %v1012_v4 = vrot.slane %v892_v20, 2  ;;  %v1011_v27 = vrot.slane %v890_v21, 2  ;;  %v788_v8 = vmul.f32 %v2782_v12, %v77_v62  ;;  %v787_v9 = vmul.f32 %v2782_v12, %v76_v63  ;;  %v78_v62 = vld [vmem:[%s3979_s0 + $0xf0] sm:$0x3f] }
  0xa8   :  { %v1267_v40 = vmax.f32 %v1203_v16, 0.0  ;;  %v1266_v7 = vmax.f32 %v1202_v19, 0.0  ;;  %436 = vrot.lane.b32.xlu1 %v271_v47, %s2707_s11  ;;  %434 = vrot.lane.b32.xlu0 %v270_v57, %s2707_s11  ;;  %v786_v47 = vmul.f32 %v2782_v12, %v3287_v33  ;;  %v176_v33 = vadd.f32 %v3216_v13, %v111_v35 }
  0xa9   :  { %v1077_v26 = vsel %vm1069_vm2, %v892_v20, %v1012_v4  ;;  %v1076_v34 = vsel %vm1069_vm2, %v890_v21, %v1011_v27  ;;  %v179_v4 = vadd.f32 %v3216_v13, %v114_v52 }
  0xaa   :  { %v1470_v6 = vcombine.low %v1266_v7, %v1267_v40  ;;  %v1471_v39 = vcombine.high %v1266_v7, %v1267_v40  ;;  %v1205_v0 = vadd.f32 %v1077_v26, %v690_v3  ;;  %v1204_v22 = vadd.f32 %v1076_v34, %v689_v25  ;;  %v381_v36 = vpop.permute.xlu1 %380  ;;  %v379_v31 = vpop.permute.xlu0 %378 }
  0xab   :  { %v499_v48 = vrot.slane %v381_v36, 2  ;;  %v498_v51 = vrot.slane %v379_v31, 2  ;;  %v275_v7 = vmul.f32 %v2760_v5, %v3343_v14 }
  0xac   :  { %v1269_v45 = vmax.f32 %v1205_v0, 0.0  ;;  %v1268_v46 = vmax.f32 %v1204_v22, 0.0  ;;  %440 = vrot.lane.b32.xlu1 %v273_v28, %s2707_s11  ;;  %438 = vrot.lane.b32.xlu0 %v272_v32, %s2707_s11  ;;  %v1487_v18 = vrot.slane %v1471_v39, %v3270_v58  ;;  %v1480_v15 = vrot.slane %v1470_v6, %v3270_v58 }
  0xad   :  { %v564_v63 = vsel %vm554_vm1, %v381_v36, %v499_v48  ;;  %v563_v21 = vsel %vm554_vm1, %v379_v31, %v498_v51  ;;  %v178_v28 = vadd.f32 %v3216_v13, %v113_v17  ;;  %v274_v6 = vmul.f32 %v2760_v5, %v78_v62  ;;  %v81_v36 = vld [vmem:[%s3979_s0 + $0x102] sm:$0x3f]  ;;  %v80_v31 = vld [vmem:[%s3979_s0 + $0xfc] sm:$0x3f] }
  0xae   :  { %v1472_v57 = vcombine.low %v1268_v46, %v1269_v45  ;;  %v1473_v53 = vcombine.high %v1268_v46, %v1269_v45  ;;  %v385_v43 = vpop.permute.xlu1 %384  ;;  %v383_v44 = vpop.permute.xlu0 %382  ;;  %v692_v39 = vadd.f32 %v564_v63, %v177_v60  ;;  %v691_v0 = vadd.f32 %v563_v21, %v176_v33 }
  0xaf   :  { %v501_v19 = vrot.slane %v385_v43, 2  ;;  %v500_v27 = vrot.slane %v383_v44, 2  ;;  %v276_v60 = vmul.f32 %v2760_v5, %v80_v31 }
  0xb0   :  { %v1501_v16 = vrot.slane %v1473_v53, %v3270_v58  ;;  %951 = vrot.lane.b32.xlu1 %v786_v47, %s2708_s12  ;;  %949 = vrot.lane.b32.xlu0 %v785_v59, %s2708_s12  ;;  %v1494_v20 = vrot.slane %v1472_v57, %v3270_v58  ;;  %v277_v53 = vmul.f32 %v2760_v5, %v81_v36 }
  0xb1   :  { %v566_v22 = vsel %vm554_vm1, %v385_v43, %v501_v19  ;;  %v565_v35 = vsel %vm554_vm1, %v383_v44, %v500_v27 }
  0xb2   :  { %v896_v32 = vpop.permute.xlu1 %895  ;;  %v894_v3 = vpop.permute.xlu0 %893  ;;  %v1503_v25 = vcombine.high %v1480_v15, %v1494_v20  ;;  %v1504_v40 = vcombine.low %v1487_v18, %v1501_v16  ;;  %v1502_v54 = vcombine.low %v1480_v15, %v1494_v20  ;;  %v694_v43 = vadd.f32 %v566_v22, %v179_v4 }
  0xb3   :  { %v1014_v26 = vrot.slane %v896_v32, 2  ;;  %v1013_v34 = vrot.slane %v894_v3, 2  ;;  %v693_v44 = vadd.f32 %v565_v35, %v178_v28  ;;  %v115_v4 = vmul.f32 %v3205_v61, %v3018_v50 }
  0xb4   :  { %955 = vrot.lane.b32.xlu1 %v788_v8, %s2708_s12  ;;  %953 = vrot.lane.b32.xlu0 %v787_v9, %s2708_s12  ;;  %v116_v9 = vmul.f32 %v3205_v61, %v3013_v49  ;;  %v789_v49 = vmul.f32 %v2782_v12, %v78_v62  ;;  %v792_v62 = vmul.f32 %v2782_v12, %v81_v36  ;;  %v82_v36 = vld [vmem:[%s3979_s0 + $0x108] sm:$0x3f] }
  0xb5   :  { %v1079_v45 = vsel %vm1069_vm2, %v896_v32, %v1014_v26  ;;  %v1078_v46 = vsel %vm1069_vm2, %v894_v3, %v1013_v34  ;;  %2133 = vmatprep.mubr.f32.mxu0 %v1503_v25  ;;  %2560 = vmatmul.mubr.msk.f32.vlgmr.msra.gmra.mrb[0].mxu1 %vm2027_vm3, %v1504_v40  ;;  %v790_v32 = vmul.f32 %v2782_v12, %v3343_v14 }
  0xb6   :  { %v1207_v47 = vadd.f32 %v1079_v45, %v692_v39  ;;  %v1206_v59 = vadd.f32 %v1078_v46, %v691_v0  ;;  %2134 = vmatmul.mubr.f32.gmra.mrb[2].mxu0 %v1502_v54  ;;  %v900_v48 = vpop.permute.xlu1 %899  ;;  %v898_v51 = vpop.permute.xlu0 %897  ;;  %v118_v40 = vmul.f32 %v3205_v61, %v3032_v55  ;;  %v181_v50 = vadd.f32 %v3216_v13, %v116_v9  ;;  %v3400_v55 = vld [vmem:[%s3979_s0 + $0x10e] sm:$0x3f] }
  0xb7   :  { %v1016_v52 = vrot.slane %v900_v48, 2  ;;  %v1015_v57 = vrot.slane %v898_v51, 2  ;;  %v180_v14 = vadd.f32 %v3216_v13, %v115_v4  ;;  %v791_v0 = vmul.f32 %v2782_v12, %v80_v31 }
  0xb8   :  { %v1271_v17 = vmax.f32 %v1207_v47, 0.0  ;;  %v1270_v18 = vmax.f32 %v1206_v59, 0.0  ;;  %444 = vrot.lane.b32.xlu1 %v275_v7, %s2707_s11  ;;  %442 = vrot.lane.b32.xlu0 %v274_v6, %s2707_s11  ;;  %v117_v6 = vmul.f32 %v3205_v61, %v3037_v56  ;;  %v183_v47 = vadd.f32 %v3216_v13, %v118_v40 }
  0xb9   :  { %v1081_v33 = vsel %vm1069_vm2, %v900_v48, %v1016_v52  ;;  %v1080_v8 = vsel %vm1069_vm2, %v898_v51, %v1015_v57 }
  0xba   :  { %v1505_v16 = vcombine.low %v1270_v18, %v1271_v17  ;;  %v1506_v19 = vcombine.high %v1270_v18, %v1271_v17  ;;  %v1209_v15 = vadd.f32 %v1081_v33, %v694_v43  ;;  %v1208_v20 = vadd.f32 %v1080_v8, %v693_v44  ;;  %v389_v63 = vpop.permute.xlu1 %388  ;;  %v387_v21 = vpop.permute.xlu0 %386 }
  0xbb   :  { %v503_v3 = vrot.slane %v389_v63, 2  ;;  %v502_v25 = vrot.slane %v387_v21, 2  ;;  %v182_v48 = vadd.f32 %v3216_v13, %v117_v6  ;;  %v278_v18 = vmul.f32 %v2760_v5, %v82_v36 }
  0xbc   :  { %v1273_v27 = vmax.f32 %v1209_v15, 0.0  ;;  %v1272_v28 = vmax.f32 %v1208_v20, 0.0  ;;  %448 = vrot.lane.b32.xlu1 %v277_v53, %s2707_s11  ;;  %446 = vrot.lane.b32.xlu0 %v276_v60, %s2707_s11  ;;  %v1522_v39 = vrot.slane %v1506_v19, %v3270_v58  ;;  %v1515_v56 = vrot.slane %v1505_v16, %v3270_v58  ;;  %v85_v16 = vld [vmem:[%s3979_s0 + $0x11a] sm:$0x3f]  ;;  %v84_v19 = vld [vmem:[%s3979_s0 + $0x114] sm:$0x3f] }
  0xbd   :  { %v568_v31 = vsel %vm554_vm1, %v389_v63, %v503_v3  ;;  %v567_v46 = vsel %vm554_vm1, %v387_v21, %v502_v25  ;;  %v279_v60 = vmul.f32 %v2760_v5, %v3400_v55  ;;  %v281_v3 = vmul.f32 %v2760_v5, %v85_v16 }
  0xbe   :  { %v1507_v7 = vcombine.low %v1272_v28, %v1273_v27  ;;  %v1508_v26 = vcombine.high %v1272_v28, %v1273_v27  ;;  %v393_v34 = vpop.permute.xlu1 %392  ;;  %v391_v54 = vpop.permute.xlu0 %390  ;;  %v696_v33 = vadd.f32 %v568_v31, %v181_v50  ;;  %v695_v8 = vadd.f32 %v567_v46, %v180_v14 }
  0xbf   :  { %v505_v35 = vrot.slane %v393_v34, 2  ;;  %v504_v59 = vrot.slane %v391_v54, 2  ;;  %v280_v25 = vmul.f32 %v2760_v5, %v84_v19  ;;  %v120_v6 = vmul.f32 %v3205_v61, %v3060_v1 }
  0xc0   :  { %v1536_v22 = vrot.slane %v1508_v26, %v3270_v58  ;;  %959 = vrot.lane.b32.xlu1 %v790_v32, %s2708_s12  ;;  %957 = vrot.lane.b32.xlu0 %v789_v49, %s2708_s12  ;;  %v1529_v45 = vrot.slane %v1507_v7, %v3270_v58  ;;  %v794_v46 = vmul.f32 %v2782_v12, %v3400_v55 }
  0xc1   :  { %v570_v9 = vsel %vm554_vm1, %v393_v34, %v505_v35  ;;  %v569_v15 = vsel %vm554_vm1, %v391_v54, %v504_v59  ;;  %v793_v1 = vmul.f32 %v2782_v12, %v82_v36  ;;  %v796_v36 = vmul.f32 %v2782_v12, %v85_v16 }
  0xc2   :  { %v904_v51 = vpop.permute.xlu1 %903  ;;  %v902_v52 = vpop.permute.xlu0 %901  ;;  %v1538_v57 = vcombine.high %v1515_v56, %v1529_v45  ;;  %v1539_v53 = vcombine.low %v1522_v39, %v1536_v22  ;;  %v1537_v17 = vcombine.low %v1515_v56, %v1529_v45  ;;  %v698_v40 = vadd.f32 %v570_v9, %v183_v47 }
  0xc3   :  { %v1018_v43 = vrot.slane %v904_v51, 2  ;;  %v1017_v44 = vrot.slane %v902_v52, 2  ;;  %v697_v7 = vadd.f32 %v569_v15, %v182_v48  ;;  %v119_v56 = vmul.f32 %v3205_v61, %v3065_v2 }
  0xc4   :  { %963 = vrot.lane.b32.xlu1 %v792_v62, %s2708_s12  ;;  %961 = vrot.lane.b32.xlu0 %v791_v0, %s2708_s12  ;;  %v122_v48 = vmul.f32 %v3205_v61, %v3076_v10  ;;  %v185_v2 = vadd.f32 %v3216_v13, %v120_v6  ;;  %v3457_v10 = vld [vmem:[%s3979_s0 + $0x126] sm:$0x3f] }
  0xc5   :  { %v1083_v20 = vsel %vm1069_vm2, %v904_v51, %v1018_v43  ;;  %v1082_v63 = vsel %vm1069_vm2, %v902_v52, %v1017_v44  ;;  %2138 = vmatprep.mubr.f32.mxu0 %v1538_v57  ;;  %2562 = vmatprep.mubr.msk.f32.mxu1 %vm2027_vm3, %v1539_v53  ;;  %v184_v55 = vadd.f32 %v3216_v13, %v119_v56 }
  0xc6   :  { %v1211_v21 = vadd.f32 %v1083_v20, %v696_v33  ;;  %v1210_v4 = vadd.f32 %v1082_v63, %v695_v8  ;;  %2139 = vmatmul.mubr.f32.gmra.mrb[4].mxu0 %v1537_v17  ;;  %v908_v27 = vpop.permute.xlu1 %907  ;;  %v906_v28 = vpop.permute.xlu0 %905  ;;  %v795_v44 = vmul.f32 %v2782_v12, %v84_v19  ;;  %v86_v8 = vld [vmem:[%s3979_s0 + $0x120] sm:$0x3f]  ;;  %v187_v19 = vadd.f32 %v3216_v13, %v122_v48 }
  0xc7   :  { %v1020_v32 = vrot.slane %v908_v27, 2  ;;  %v1019_v49 = vrot.slane %v906_v28, 2 }
  0xc8   :  { %v1275_v26 = vmax.f32 %v1211_v21, 0.0  ;;  %v1274_v50 = vmax.f32 %v1210_v4, 0.0  ;;  %452 = vrot.lane.b32.xlu1 %v279_v60, %s2707_s11  ;;  %450 = vrot.lane.b32.xlu0 %v278_v18, %s2707_s11  ;;  %v121_v60 = vmul.f32 %v3205_v61, %v3081_v11 }
  0xc9   :  { %v1085_v34 = vsel %vm1069_vm2, %v908_v27, %v1020_v32  ;;  %v1084_v54 = vsel %vm1069_vm2, %v906_v28, %v1019_v49  ;;  %v283_v28 = vmul.f32 %v2760_v5, %v3457_v10 }
  0xca   :  { %v1540_v39 = vcombine.low %v1274_v50, %v1275_v26  ;;  %v1541_v14 = vcombine.high %v1274_v50, %v1275_v26  ;;  %v1213_v62 = vadd.f32 %v1085_v34, %v698_v40  ;;  %v1212_v0 = vadd.f32 %v1084_v54, %v697_v7  ;;  %v397_v22 = vpop.permute.xlu1 %396  ;;  %v395_v35 = vpop.permute.xlu0 %394  ;;  %v89_v50 = vld [vmem:[%s3979_s0 + $0x132] sm:$0x3f]  ;;  %v88_v34 = vld [vmem:[%s3979_s0 + $0x12c] sm:$0x3f] }
  0xcb   :  { %v507_v47 = vrot.slane %v397_v22, 2  ;;  %v506_v59 = vrot.slane %v395_v35, 2  ;;  %v186_v20 = vadd.f32 %v3216_v13, %v121_v60 }
  0xcc   :  { %v1277_v45 = vmax.f32 %v1213_v62, 0.0  ;;  %v1276_v31 = vmax.f32 %v1212_v0, 0.0  ;;  %456 = vrot.lane.b32.xlu1 %v281_v3, %s2707_s11  ;;  %454 = vrot.lane.b32.xlu0 %v280_v25, %s2707_s11  ;;  %v1557_v43 = vrot.slane %v1541_v14, %v3270_v58  ;;  %v1550_v11 = vrot.slane %v1540_v39, %v3270_v58 }
  0xcd   :  { %v572_v9 = vsel %vm554_vm1, %v397_v22, %v507_v47  ;;  %v571_v16 = vsel %vm554_vm1, %v395_v35, %v506_v59  ;;  %v282_v25 = vmul.f32 %v2760_v5, %v86_v8 }
  0xce   :  { %v1542_v51 = vcombine.low %v1276_v31, %v1277_v45  ;;  %v1543_v52 = vcombine.high %v1276_v31, %v1277_v45  ;;  %v401_v57 = vpop.permute.xlu1 %400  ;;  %v399_v53 = vpop.permute.xlu0 %398  ;;  %v700_v40 = vadd.f32 %v572_v9, %v185_v2  ;;  %v699_v7 = vadd.f32 %v571_v16, %v184_v55 }
  0xcf   :  { %v509_v18 = vrot.slane %v401_v57, 2  ;;  %v508_v15 = vrot.slane %v399_v53, 2  ;;  %v285_v45 = vmul.f32 %v2760_v5, %v89_v50  ;;  %v284_v31 = vmul.f32 %v2760_v5, %v88_v34 }
  0xd0   :  { %v1571_v17 = vrot.slane %v1543_v52, %v3270_v58  ;;  %967 = vrot.lane.b32.xlu1 %v794_v46, %s2708_s12  ;;  %965 = vrot.lane.b32.xlu0 %v793_v1, %s2708_s12  ;;  %v1564_v33 = vrot.slane %v1542_v51, %v3270_v58  ;;  %v124_v52 = vmul.f32 %v3205_v61, %v3104_v23 }
  0xd1   :  { %v574_v26 = vsel %vm554_vm1, %v401_v57, %v509_v18  ;;  %v573_v54 = vsel %vm554_vm1, %v399_v53, %v508_v15  ;;  %v798_v18 = vmul.f32 %v2782_v12, %v3457_v10  ;;  %v797_v23 = vmul.f32 %v2782_v12, %v86_v8 }
  0xd2   :  { %v912_v63 = vpop.permute.xlu1 %911  ;;  %v910_v21 = vpop.permute.xlu0 %909  ;;  %v1573_v4 = vcombine.high %v1550_v11, %v1564_v33  ;;  %v1574_v27 = vcombine.low %v1557_v43, %v1571_v17  ;;  %v1572_v3 = vcombine.low %v1550_v11, %v1564_v33  ;;  %v702_v46 = vadd.f32 %v574_v26, %v187_v19 }
  0xd3   :  { %v1022_v32 = vrot.slane %v912_v63, 2  ;;  %v1021_v49 = vrot.slane %v910_v21, 2  ;;  %v701_v1 = vadd.f32 %v573_v54, %v186_v20  ;;  %v126_v9 = vmul.f32 %v3205_v61, %v3120_v29  ;;  %v3514_v29 = vld [vmem:[%s3979_s0 + $0x13e] sm:$0x3f] }
  0xd4   :  { %971 = vrot.lane.b32.xlu1 %v796_v36, %s2708_s12  ;;  %969 = vrot.lane.b32.xlu0 %v795_v44, %s2708_s12  ;;  %v123_v36 = vmul.f32 %v3205_v61, %v3109_v24  ;;  %v189_v24 = vadd.f32 %v3216_v13, %v124_v52  ;;  %v800_v8 = vmul.f32 %v2782_v12, %v89_v50 }
  0xd5   :  { %v1087_v6 = vsel %vm1069_vm2, %v912_v63, %v1022_v32  ;;  %v1086_v39 = vsel %vm1069_vm2, %v910_v21, %v1021_v49  ;;  %2143 = vmatprep.mubr.f32.mxu0 %v1573_v4  ;;  %2563 = vmatmul.mubr.msk.f32.gmra.mrb[2].mxu1 %vm2027_vm3, %v1574_v27  ;;  %v125_v63 = vmul.f32 %v3205_v61, %v3125_v30  ;;  %v3524_v49 = vld [vmem:[%s3979_s0 + $0x138] sm:$0x3f] }
  0xd6   :  { %v1215_v14 = vadd.f32 %v1087_v6, %v700_v40  ;;  %v1214_v62 = vadd.f32 %v1086_v39, %v699_v7  ;;  %2144 = vmatmul.mubr.f32.gmra.mrb[6].mxu0 %v1572_v3  ;;  %v916_v0 = vpop.permute.xlu1 %915  ;;  %v914_v22 = vpop.permute.xlu0 %913  ;;  %v188_v10 = vadd.f32 %v3216_v13, %v123_v36  ;;  %v799_v4 = vmul.f32 %v2782_v12, %v88_v34 }
  0xd7   :  { %v1024_v35 = vrot.slane %v916_v0, 2  ;;  %v1023_v56 = vrot.slane %v914_v22, 2  ;;  %v191_v40 = vadd.f32 %v3216_v13, %v126_v9  ;;  %v190_v26 = vadd.f32 %v3216_v13, %v125_v63 }
  0xd8   :  { %v1279_v47 = vmax.f32 %v1215_v14, 0.0  ;;  %v1278_v59 = vmax.f32 %v1214_v62, 0.0  ;;  %460 = vrot.lane.b32.xlu1 %v283_v28, %s2707_s11  ;;  %458 = vrot.lane.b32.xlu0 %v282_v25, %s2707_s11  ;;  %v287_v39 = vmul.f32 %v2760_v5, %v3514_v29 }
  0xd9   :  { %v1089_v48 = vsel %vm1069_vm2, %v916_v0, %v1024_v35  ;;  %v1088_v51 = vsel %vm1069_vm2, %v914_v22, %v1023_v56  ;;  %v286_v22 = vmul.f32 %v2760_v5, %v3524_v49 }
  0xda   :  { %v1575_v2 = vcombine.low %v1278_v59, %v1279_v47  ;;  %v1576_v57 = vcombine.high %v1278_v59, %v1279_v47  ;;  %v1217_v53 = vadd.f32 %v1089_v48, %v702_v46  ;;  %v1216_v60 = vadd.f32 %v1088_v51, %v701_v1  ;;  %v405_v43 = vpop.permute.xlu1 %404  ;;  %v403_v55 = vpop.permute.xlu0 %402  ;;  %v3545_v46 = vld [vmem:[%s3979_s0 + $0x144] sm:$0x3f] }
  0xdb   :  { %v511_v11 = vrot.slane %v405_v43, 2  ;;  %v510_v33 = vrot.slane %v403_v55, 2 }
  0xdc   :  { %v1281_v44 = vmax.f32 %v1217_v53, 0.0  ;;  %v1280_v17 = vmax.f32 %v1216_v60, 0.0  ;;  %464 = vrot.lane.b32.xlu1 %v285_v45, %s2707_s11  ;;  %462 = vrot.lane.b32.xlu0 %v284_v31, %s2707_s11  ;;  %v1592_v21 = vrot.slane %v1576_v57, %v3270_v58  ;;  %v1585_v30 = vrot.slane %v1575_v2, %v3270_v58  ;;  %v3540_v31 = vld [vmem:[%s3979_s0 + $0x14a] sm:$0x3f] }
  0xdd   :  { %v576_v3 = vsel %vm554_vm1, %v405_v43, %v511_v11  ;;  %v575_v25 = vsel %vm554_vm1, %v403_v55, %v510_v33  ;;  %v289_v60 = vmul.f32 %v2760_v5, %v3540_v31  ;;  %v288_v43 = vmul.f32 %v2760_v5, %v3545_v46 }
  0xde   :  { %v1577_v16 = vcombine.low %v1280_v17, %v1281_v44  ;;  %v1578_v19 = vcombine.high %v1280_v17, %v1281_v44  ;;  %v409_v15 = vpop.permute.xlu1 %408  ;;  %v407_v20 = vpop.permute.xlu0 %406  ;;  %v704_v35 = vadd.f32 %v576_v3, %v189_v24  ;;  %v703_v56 = vadd.f32 %v575_v25, %v188_v10 }
  0xdf   :  { %v513_v28 = vrot.slane %v409_v15, 2  ;;  %v512_v7 = vrot.slane %v407_v20, 2  ;;  %v128_v11 = vmul.f32 %v3205_v61, %v3148_v37  ;;  %v802_v10 = vmul.f32 %v2782_v12, %v3514_v29 }
  0xe0   :  { %v1606_v27 = vrot.slane %v1578_v19, %v3270_v58  ;;  %975 = vrot.lane.b32.xlu1 %v798_v18, %s2708_s12  ;;  %973 = vrot.lane.b32.xlu0 %v797_v23, %s2708_s12  ;;  %v1599_v32 = vrot.slane %v1577_v16, %v3270_v58  ;;  %v801_v37 = vmul.f32 %v2782_v12, %v3524_v49 }
  0xe1   :  { %v578_v45 = vsel %vm554_vm1, %v409_v15, %v513_v28  ;;  %v577_v1 = vsel %vm554_vm1, %v407_v20, %v512_v7  ;;  %v127_v20 = vmul.f32 %v3205_v61, %v3153_v38  ;;  %v193_v38 = vadd.f32 %v3216_v13, %v128_v11 }
  0xe2   :  { %v920_v50 = vpop.permute.xlu1 %919  ;;  %v918_v34 = vpop.permute.xlu0 %917  ;;  %v1608_v54 = vcombine.high %v1585_v30, %v1599_v32  ;;  %v1609_v6 = vcombine.low %v1592_v21, %v1606_v27  ;;  %v1607_v0 = vcombine.low %v1585_v30, %v1599_v32  ;;  %v706_v55 = vadd.f32 %v578_v45, %v191_v40 }
  0xe3   :  { %v1026_v14 = vrot.slane %v920_v50, 2  ;;  %v1025_v62 = vrot.slane %v918_v34, 2  ;;  %v705_v36 = vadd.f32 %v577_v1, %v190_v26  ;;  %v130_v27 = vmul.f32 %v3205_v61, %v3164_v41  ;;  %v3583_v41 = vld [vmem:[%s3979_s0 + $0x156] sm:$0x3f] }
  0xe4   :  { %979 = vrot.lane.b32.xlu1 %v800_v8, %s2708_s12  ;;  %977 = vrot.lane.b32.xlu0 %v799_v4, %s2708_s12  ;;  %v129_v25 = vmul.f32 %v3205_v61, %v3169_v42  ;;  %v192_v7 = vadd.f32 %v3216_v13, %v127_v20  ;;  %v804_v26 = vmul.f32 %v2782_v12, %v3540_v31 }
  0xe5   :  { %v1091_v47 = vsel %vm1069_vm2, %v920_v50, %v1026_v14  ;;  %v1090_v59 = vsel %vm1069_vm2, %v918_v34, %v1025_v62  ;;  %2148 = vmatprep.mubr.f32.mxu0 %v1608_v54  ;;  %2565 = vmatprep.mubr.msk.f32.mxu1 %vm2027_vm3, %v1609_v6  ;;  %v803_v50 = vmul.f32 %v2782_v12, %v3545_v46 }
  0xe6   :  { %v1219_v48 = vadd.f32 %v1091_v47, %v704_v35  ;;  %v1218_v51 = vadd.f32 %v1090_v59, %v703_v56  ;;  %2149 = vmatmul.mubr.f32.gmra.mrb[8].mxu0 %v1607_v0  ;;  %v924_v52 = vpop.permute.xlu1 %923  ;;  %v922_v2 = vpop.permute.xlu0 %921  ;;  %v195_v0 = vadd.f32 %v3216_v13, %v130_v27  ;;  %v194_v35 = vadd.f32 %v3216_v13, %v129_v25 }
  0xe7   :  { %v1028_v57 = vrot.slane %v924_v52, 2  ;;  %v1027_v53 = vrot.slane %v922_v2, 2  ;;  %v291_v59 = vmul.f32 %v2760_v5, %v3583_v41 }
  0xe8   :  { %v1283_v44 = vmax.f32 %v1219_v48, 0.0  ;;  %v1282_v17 = vmax.f32 %v1218_v51, 0.0  ;;  %468 = vrot.lane.b32.xlu1 %v287_v39, %s2707_s11  ;;  %466 = vrot.lane.b32.xlu0 %v286_v22, %s2707_s11  ;;  %v3593_v39 = vld [vmem:[%s3979_s0 + $0x150] sm:$0x3f] }
  0xe9   :  { %v1093_v18 = vsel %vm1069_vm2, %v924_v52, %v1028_v57  ;;  %v1092_v23 = vsel %vm1069_vm2, %v922_v2, %v1027_v53  ;;  %v290_v2 = vmul.f32 %v2760_v5, %v3593_v39 }
  0xea   :  { %v1610_v33 = vcombine.low %v1282_v17, %v1283_v44  ;;  %v1611_v9 = vcombine.high %v1282_v17, %v1283_v44  ;;  %v1221_v16 = vadd.f32 %v1093_v18, %v706_v55  ;;  %v1220_v19 = vadd.f32 %v1092_v23, %v705_v36  ;;  %v413_v24 = vpop.permute.xlu1 %412  ;;  %v411_v15 = vpop.permute.xlu0 %410  ;;  %v3614_v55 = vld [vmem:[%s3979_s0 + $0x15c] sm:$0x3f] }
  0xeb   :  { %v515_v8 = vrot.slane %v413_v24, 2  ;;  %v514_v4 = vrot.slane %v411_v15, 2 }
  0xec   :  { %v1285_v63 = vmax.f32 %v1221_v16, 0.0  ;;  %v1284_v21 = vmax.f32 %v1220_v19, 0.0  ;;  %472 = vrot.lane.b32.xlu1 %v289_v60, %s2707_s11  ;;  %470 = vrot.lane.b32.xlu0 %v288_v43, %s2707_s11  ;;  %v1627_v40 = vrot.slane %v1611_v9, %v3270_v58  ;;  %v1620_v42 = vrot.slane %v1610_v33, %v3270_v58  ;;  %v3609_v43 = vld [vmem:[%s3979_s0 + $0x162] sm:$0x3f] }
  0xed   :  { %v580_v14 = vsel %vm554_vm1, %v413_v24, %v515_v8  ;;  %v579_v62 = vsel %vm554_vm1, %v411_v15, %v514_v4  ;;  %v293_v19 = vmul.f32 %v2760_v5, %v3609_v43  ;;  %v292_v24 = vmul.f32 %v2760_v5, %v3614_v55 }
  0xee   :  { %v1612_v28 = vcombine.low %v1284_v21, %v1285_v63  ;;  %v1613_v30 = vcombine.high %v1284_v21, %v1285_v63  ;;  %v417_v32 = vpop.permute.xlu1 %416  ;;  %v415_v3 = vpop.permute.xlu0 %414  ;;  %v708_v57 = vadd.f32 %v580_v14, %v193_v38  ;;  %v707_v53 = vadd.f32 %v579_v62, %v192_v7 }
  0xef   :  { %v517_v54 = vrot.slane %v417_v32, 2  ;;  %v516_v22 = vrot.slane %v415_v3, 2 }
  0xf0   :  { %v1641_v34 = vrot.slane %v1613_v30, %v3270_v58  ;;  %983 = vrot.lane.b32.xlu1 %v802_v10, %s2708_s12  ;;  %981 = vrot.lane.b32.xlu0 %v801_v37, %s2708_s12  ;;  %v1634_v6 = vrot.slane %v1612_v28, %v3270_v58  ;;  %v2644_v28 = vld [vmem:[%s3979_s0 + $0xae] sm:$0x3f] }
  0xf1   :  { %v582_v60 = vsel %vm554_vm1, %v417_v32, %v517_v54  ;;  %v581_v36 = vsel %vm554_vm1, %v415_v3, %v516_v22  ;;  %v132_v30 = vmul.f32 %v2644_v28, %v3205_v61  ;;  %v2645_v3 = vld [vmem:[%s3979_s0 + $0xa8] sm:$0x3f] }
  0xf2   :  { %v928_v56 = vpop.permute.xlu1 %927  ;;  %v926_v45 = vpop.permute.xlu0 %925  ;;  %v1643_v1 = vcombine.high %v1620_v42, %v1634_v6  ;;  %v1644_v47 = vcombine.low %v1627_v40, %v1641_v34  ;;  %v1642_v52 = vcombine.low %v1620_v42, %v1634_v6  ;;  %v710_v15 = vadd.f32 %v582_v60, %v195_v0  ;;  %v2646_v6 = vld [vmem:[%s3979_s0 + $0xba] sm:$0x3f] }
  0xf3   :  { %v1030_v48 = vrot.slane %v928_v56, 2  ;;  %v1029_v51 = vrot.slane %v926_v45, 2  ;;  %v709_v20 = vadd.f32 %v581_v36, %v194_v35  ;;  %v131_v25 = vmul.f32 %v2645_v3, %v3205_v61  ;;  %v3670_v36 = vld [vmem:[%s3979_s0 + $0x168] sm:$0x3f] }
  0xf4   :  { %987 = vrot.lane.b32.xlu1 %v804_v26, %s2708_s12  ;;  %985 = vrot.lane.b32.xlu0 %v803_v50, %s2708_s12  ;;  %v806_v40 = vmul.f32 %v2782_v12, %v3583_v41  ;;  %v805_v34 = vmul.f32 %v2782_v12, %v3593_v39  ;;  %v134_v14 = vmul.f32 %v2646_v6, %v3205_v61 }
  0xf5   :  { %v1095_v44 = vsel %vm1069_vm2, %v928_v56, %v1030_v48  ;;  %v1094_v17 = vsel %vm1069_vm2, %v926_v45, %v1029_v51  ;;  %2153 = vmatprep.mubr.f32.mxu0 %v1643_v1  ;;  %2566 = vmatmul.mubr.msk.f32.gmra.mrb[4].mxu1 %vm2027_vm3, %v1644_v47  ;;  %v197_v22 = vadd.f32 %v3216_v13, %v132_v30  ;;  %v2647_v45 = vld [vmem:[%s3979_s0 + $0xb4] sm:$0x3f] }
  0xf6   :  { %v1223_v18 = vadd.f32 %v1095_v44, %v708_v57  ;;  %v1222_v23 = vadd.f32 %v1094_v17, %v707_v53  ;;  %2154 = vmatmul.mubr.f32.gmra.mrb[10].mxu0 %v1642_v52  ;;  %v932_v11 = vpop.permute.xlu1 %931  ;;  %v930_v33 = vpop.permute.xlu0 %929  ;;  %v133_v1 = vmul.f32 %v2647_v45, %v3205_v61  ;;  %v808_v48 = vmul.f32 %v2782_v12, %v3609_v43  ;;  %v3660_v52 = vld [vmem:[%s3979_s0 + $0x16e] sm:$0x3f] }
  0xf7   :  { %v1032_v9 = vrot.slane %v932_v11, 2  ;;  %v1031_v16 = vrot.slane %v930_v33, 2  ;;  %v807_v51 = vmul.f32 %v2782_v12, %v3614_v55 }
  0xf8   :  { %v1287_v63 = vmax.f32 %v1223_v18, 0.0  ;;  %v1286_v21 = vmax.f32 %v1222_v23, 0.0  ;;  %476 = vrot.lane.b32.xlu1 %v291_v59, %s2707_s11  ;;  %474 = vrot.lane.b32.xlu0 %v290_v2, %s2707_s11  ;;  %v196_v59 = vadd.f32 %v3216_v13, %v131_v25  ;;  %v199_v18 = vadd.f32 %v3216_v13, %v134_v14 }
  0xf9   :  { %v1097_v10 = vsel %vm1069_vm2, %v932_v11, %v1032_v9  ;;  %v1096_v37 = vsel %vm1069_vm2, %v930_v33, %v1031_v16  ;;  %v198_v11 = vadd.f32 %v3216_v13, %v133_v1 }
  0xfa   :  { %v1225_v8 = vadd.f32 %v1097_v10, %v710_v15  ;;  %v1224_v4 = vadd.f32 %v1096_v37, %v709_v20  ;;  %v421_v27 = vpop.permute.xlu1 %420  ;;  %v419_v38 = vpop.permute.xlu0 %418  ;;  %v1646_v32 = vcombine.high %v1286_v21, %v1287_v63  ;;  %v1645_v7 = vcombine.low %v1286_v21, %v1287_v63 }
  0xfb   :  { %v519_v54 = vrot.slane %v421_v27, 2  ;;  %v518_v42 = vrot.slane %v419_v38, 2  ;;  %v294_v21 = vmul.f32 %v2760_v5, %v3670_v36 }
  0xfc   :  { %v1289_v26 = vmax.f32 %v1225_v8, 0.0  ;;  %v1288_v50 = vmax.f32 %v1224_v4, 0.0  ;;  %480 = vrot.lane.b32.xlu1 %v293_v19, %s2707_s11  ;;  %478 = vrot.lane.b32.xlu0 %v292_v24, %s2707_s11  ;;  %v1662_v47 = vrot.slane %v1646_v32, %v3270_v58  ;;  %v1655_v53 = vrot.slane %v1645_v7, %v3270_v58  ;;  %v3686_v4 = vld [vmem:[%s3979_s0 + $0x17a] sm:$0x3f] }
  0xfd   :  { %v584_v44 = vsel %vm554_vm1, %v421_v27, %v519_v54  ;;  %v583_v17 = vsel %vm554_vm1, %v419_v38, %v518_v42  ;;  %v295_v24 = vmul.f32 %v2760_v5, %v3660_v52  ;;  %v3691_v27 = vld [vmem:[%s3979_s0 + $0x174] sm:$0x3f] }
  0xfe   :  { %v1647_v62 = vcombine.low %v1288_v50, %v1289_v26  ;;  %v1648_v0 = vcombine.high %v1288_v50, %v1289_v26  ;;  %v425_v35 = vpop.permute.xlu1 %424  ;;  %v423_v56 = vpop.permute.xlu0 %422  ;;  %v712_v10 = vadd.f32 %v584_v44, %v197_v22  ;;  %v711_v37 = vadd.f32 %v583_v17, %v196_v59  ;;  %v2648_v22 = vld [vmem:[%s3979_s0 + $0xc6] sm:$0x3f] }
  0xff   :  { %v521_v57 = vrot.slane %v425_v35, 2  ;;  %v520_v23 = vrot.slane %v423_v56, 2  ;;  %v297_v50 = vmul.f32 %v2760_v5, %v3686_v4 }
 0x100   :  { %v1676_v2 = vrot.slane %v1648_v0, %v3270_v58  ;;  %991 = vrot.lane.b32.xlu1 %v806_v40, %s2708_s12  ;;  %989 = vrot.lane.b32.xlu0 %v805_v34, %s2708_s12  ;;  %v1669_v60 = vrot.slane %v1647_v62, %v3270_v58  ;;  %v296_v34 = vmul.f32 %v2760_v5, %v3691_v27 }
 0x101   :  { %v586_v8 = vsel %vm554_vm1, %v425_v35, %v521_v57  ;;  %v585_v28 = vsel %vm554_vm1, %v423_v56, %v520_v23  ;;  %v136_v35 = vmul.f32 %v2648_v22, %v3205_v61 }
 0x102   :  { %v936_v33 = vpop.permute.xlu1 %935  ;;  %v934_v9 = vpop.permute.xlu0 %933  ;;  %v1678_v16 = vcombine.high %v1655_v53, %v1669_v60  ;;  %v1679_v19 = vcombine.low %v1662_v47, %v1676_v2  ;;  %v1677_v63 = vcombine.low %v1655_v53, %v1669_v60  ;;  %v714_v54 = vadd.f32 %v586_v8, %v199_v18  ;;  %v2649_v47 = vld [vmem:[%s3979_s0 + $0xc0] sm:$0x3f] }
 0x103   :  { %v1034_v15 = vrot.slane %v936_v33, 2  ;;  %v1033_v20 = vrot.slane %v934_v9, 2  ;;  %v713_v42 = vadd.f32 %v585_v28, %v198_v11  ;;  %v135_v59 = vmul.f32 %v2649_v47, %v3205_v61 }
 0x104   :  { %995 = vrot.lane.b32.xlu1 %v808_v48, %s2708_s12  ;;  %993 = vrot.lane.b32.xlu0 %v807_v51, %s2708_s12  ;;  %v810_v51 = vmul.f32 %v2782_v12, %v3660_v52  ;;  %v809_v60 = vmul.f32 %v2782_v12, %v3670_v36  ;;  %v201_v44 = vadd.f32 %v3216_v13, %v136_v35 }
 0x105   :  { %v1099_v30 = vsel %vm1069_vm2, %v936_v33, %v1034_v15  ;;  %v1098_v38 = vsel %vm1069_vm2, %v934_v9, %v1033_v20  ;;  %2158 = vmatprep.mubr.f32.mxu0 %v1678_v16  ;;  %2568 = vmatprep.mubr.msk.f32.mxu1 %vm2027_vm3, %v1679_v19  ;;  %v200_v33 = vadd.f32 %v3216_v13, %v135_v59  ;;  %v2650_v16 = vld [vmem:[%s3979_s0 + $0xd2] sm:$0x3f]  ;;  %v2651_v20 = vld [vmem:[%s3979_s0 + $0xcc] sm:$0x3f] }
 0x106   :  { %v1227_v32 = vadd.f32 %v1099_v30, %v712_v10  ;;  %v1226_v3 = vadd.f32 %v1098_v38, %v711_v37  ;;  %2159 = vmatmul.mubr.f32.gmra.mrb[12].mxu0 %v1677_v63  ;;  %v940_v25 = vpop.permute.xlu1 %939  ;;  %v938_v40 = vpop.permute.xlu0 %937  ;;  %v138_v19 = vmul.f32 %v2650_v16, %v3205_v61  ;;  %v137_v63 = vmul.f32 %v2651_v20, %v3205_v61 }
 0x107   :  { %v1036_v7 = vrot.slane %v940_v25, 2  ;;  %v1035_v26 = vrot.slane %v938_v40, 2  ;;  %v811_v10 = vmul.f32 %v2782_v12, %v3691_v27 }
 0x108   :  { %v1291_v6 = vmax.f32 %v1227_v32, 0.0  ;;  %v1290_v14 = vmax.f32 %v1226_v3, 0.0  ;;  %484 = vrot.lane.b32.xlu1 %v295_v24, %s2707_s11  ;;  %482 = vrot.lane.b32.xlu0 %v294_v21, %s2707_s11  ;;  %v812_v21 = vmul.f32 %v2782_v12, %v3686_v4 }
 0x109   :  { %v1101_v62 = vsel %vm1069_vm2, %v940_v25, %v1036_v7  ;;  %v1100_v0 = vsel %vm1069_vm2, %v938_v40, %v1035_v26  ;;  %v203_v25 = vadd.f32 %v3216_v13, %v138_v19 }
 0x10a   :  { %v1229_v56 = vadd.f32 %v1101_v62, %v714_v54  ;;  %v1228_v5 = vadd.f32 %v1100_v0, %v713_v42  ;;  %v429_v45 = vpop.permute.xlu1 %428  ;;  %v427_v1 = vpop.permute.xlu0 %426  ;;  %v1681_v48 = vcombine.high %v1290_v14, %v1291_v6  ;;  %v1680_v2 = vcombine.low %v1290_v14, %v1291_v6 }
 0x10b   :  { %v523_v17 = vrot.slane %v429_v45, 2  ;;  %v522_v18 = vrot.slane %v427_v1, 2 }
 0x10c   :  { %v1293_v57 = vmax.f32 %v1229_v56, 0.0  ;;  %v1292_v53 = vmax.f32 %v1228_v5, 0.0  ;;  %488 = vrot.lane.b32.xlu1 %v297_v50, %s2707_s11  ;;  %486 = vrot.lane.b32.xlu0 %v296_v34, %s2707_s11  ;;  %v1697_v15 = vrot.slane %v1681_v48, %v3270_v58  ;;  %v1690_v28 = vrot.slane %v1680_v2, %v3270_v58 }
 0x10d   :  { %v588_v38 = vsel %vm554_vm1, %v429_v45, %v523_v17  ;;  %v587_v32 = vsel %vm554_vm1, %v427_v1, %v522_v18  ;;  %v202_v50 = vadd.f32 %v3216_v13, %v137_v63 }
 0x10e   :  { %v1682_v23 = vcombine.low %v1292_v53, %v1293_v57  ;;  %v1683_v11 = vcombine.high %v1292_v53, %v1293_v57  ;;  %v433_v9 = vpop.permute.xlu1 %432  ;;  %v431_v24 = vpop.permute.xlu0 %430  ;;  %v716_v6 = vadd.f32 %v588_v38, %v201_v44  ;;  %v715_v14 = vadd.f32 %v587_v32, %v200_v33  ;;  %v2654_v32 = vld [vmem:[%s3979_s0 + $0xea] sm:$0x3f] }
 0x10f   :  { %v525_v8 = vrot.slane %v433_v9, 2  ;;  %v524_v3 = vrot.slane %v431_v24, 2 }
 0x110   :  { %v1711_v37 = vrot.slane %v1683_v11, %v3270_v58  ;;  %999 = vrot.lane.b32.xlu1 %v810_v51, %s2708_s12  ;;  %997 = vrot.lane.b32.xlu0 %v809_v60, %s2708_s12  ;;  %v1704_v30 = vrot.slane %v1682_v23, %v3270_v58  ;;  %v2652_v11 = vld [vmem:[%s3979_s0 + $0xde] sm:$0x3f] }
 0x111   :  { %v590_v62 = vsel %vm554_vm1, %v433_v9, %v525_v8  ;;  %v589_v0 = vsel %vm554_vm1, %v431_v24, %v524_v3  ;;  %v140_v33 = vmul.f32 %v2652_v11, %v3205_v61  ;;  %v2653_v9 = vld [vmem:[%s3979_s0 + $0xd8] sm:$0x3f]  ;;  %v142_v3 = vmul.f32 %v2654_v32, %v3205_v61 }
 0x112   :  { %v944_v40 = vpop.permute.xlu1 %943  ;;  %v942_v12 = vpop.permute.xlu0 %941  ;;  %v1713_v7 = vcombine.high %v1690_v28, %v1704_v30  ;;  %v1714_v26 = vcombine.low %v1697_v15, %v1711_v37  ;;  %v1712_v42 = vcombine.low %v1690_v28, %v1704_v30  ;;  %v718_v48 = vadd.f32 %v590_v62, %v203_v25  ;;  %v2655_v25 = vld [vmem:[%s3979_s0 + $0xe4] sm:$0x3f] }
 0x113   :  { %v1038_v34 = vrot.slane %v944_v40, 2  ;;  %v1037_v54 = vrot.slane %v942_v12, 2  ;;  %v717_v51 = vadd.f32 %v589_v0, %v202_v50  ;;  %v139_v16 = vmul.f32 %v2653_v9, %v3205_v61 }
 0x114   :  { %1003 = vrot.lane.b32.xlu1 %v812_v21, %s2708_s12  ;;  %1001 = vrot.lane.b32.xlu0 %v811_v10, %s2708_s12  ;;  %v205_v30 = vadd.f32 %v3216_v13, %v140_v33 }
 0x115   :  { %v1103_v22 = vsel %vm1069_vm2, %v944_v40, %v1038_v34  ;;  %v1102_v35 = vsel %vm1069_vm2, %v942_v12, %v1037_v54  ;;  %2163 = vmatprep.mubr.f32.mxu0 %v1713_v7  ;;  %2569 = vmatmul.mubr.msk.f32.gmra.mrb[6].mxu1 %vm2027_vm3, %v1714_v26  ;;  %v204_v38 = vadd.f32 %v3216_v13, %v139_v16 }
 0x116   :  { %v1231_v56 = vadd.f32 %v1103_v22, %v716_v6  ;;  %v1230_v5 = vadd.f32 %v1102_v35, %v715_v14  ;;  %2164 = vmatmul.mubr.f32.gmra.mrb[14].mxu0 %v1712_v42  ;;  %v948_v45 = vpop.permute.xlu1 %947  ;;  %v946_v1 = vpop.permute.xlu0 %945  ;;  %v141_v40 = vmul.f32 %v2655_v25, %v3205_v61  ;;  %v207_v35 = vadd.f32 %v3216_v13, %v142_v3 }
 0x117   :  { %v1040_v47 = vrot.slane %v948_v45, 2  ;;  %v1039_v59 = vrot.slane %v946_v1, 2 }
 0x118   :  { %v1295_v2 = vmax.f32 %v1231_v56, 0.0  ;;  %v1294_v57 = vmax.f32 %v1230_v5, 0.0 }
 0x119   :  { %v1105_v53 = vsel %vm1069_vm2, %v948_v45, %v1040_v47  ;;  %v1104_v60 = vsel %vm1069_vm2, %v946_v1, %v1039_v59  ;;  %v206_v59 = vadd.f32 %v3216_v13, %v141_v40 }
 0x11a   :  { %v1233_v44 = vadd.f32 %v1105_v53, %v718_v48  ;;  %v1232_v17 = vadd.f32 %v1104_v60, %v717_v51  ;;  %v437_v18 = vpop.permute.xlu1 %436  ;;  %v435_v23 = vpop.permute.xlu0 %434  ;;  %v1715_v19 = vcombine.low %v1294_v57, %v1295_v2  ;;  %v1716_v24 = vcombine.high %v1294_v57, %v1295_v2 }
 0x11b   :  { %v527_v63 = vrot.slane %v437_v18, 2  ;;  %v526_v21 = vrot.slane %v435_v23, 2 }
 0x11c   :  { %v1297_v15 = vmax.f32 %v1233_v44, 0.0  ;;  %v1296_v20 = vmax.f32 %v1232_v17, 0.0  ;;  %v1732_v12 = vrot.slane %v1716_v24, %v3270_v58  ;;  %v1725_v26 = vrot.slane %v1715_v19, %v3270_v58 }
 0x11d   :  { %v592_v34 = vsel %vm554_vm1, %v437_v18, %v527_v63  ;;  %v591_v54 = vsel %vm554_vm1, %v435_v23, %v526_v21 }
 0x11e   :  { %v1717_v10 = vcombine.low %v1296_v20, %v1297_v15  ;;  %v1718_v37 = vcombine.high %v1296_v20, %v1297_v15  ;;  %v441_v8 = vpop.permute.xlu1 %440  ;;  %v439_v28 = vpop.permute.xlu0 %438  ;;  %v720_v1 = vadd.f32 %v592_v34, %v205_v30  ;;  %v719_v47 = vadd.f32 %v591_v54, %v204_v38 }
 0x11f   :  { %v529_v42 = vrot.slane %v441_v8, 2  ;;  %v528_v6 = vrot.slane %v439_v28, 2 }
 0x120   :  { %v1746_v7 = vrot.slane %v1718_v37, %v3270_v58  ;;  %v1739_v50 = vrot.slane %v1717_v10, %v3270_v58  ;;  %v2656_v10 = vld [vmem:[%s3979_s0 + $0xf6] sm:$0x3f] }
 0x121   :  { %v594_v48 = vsel %vm554_vm1, %v441_v8, %v529_v42  ;;  %v593_v51 = vsel %vm554_vm1, %v439_v28, %v528_v6  ;;  %v144_v37 = vmul.f32 %v2656_v10, %v3205_v61  ;;  %v2657_v8 = vld [vmem:[%s3979_s0 + $0xf0] sm:$0x3f]  ;;  %v2658_v42 = vld [vmem:[%s3979_s0 + $0x102] sm:$0x3f] }
 0x122   :  { %v952_v14 = vpop.permute.xlu1 %951  ;;  %v950_v62 = vpop.permute.xlu0 %949  ;;  %v1748_v0 = vcombine.high %v1725_v26, %v1739_v50  ;;  %v1749_v22 = vcombine.low %v1732_v12, %v1746_v7  ;;  %v1747_v45 = vcombine.low %v1725_v26, %v1739_v50  ;;  %v722_v11 = vadd.f32 %v594_v48, %v207_v35 }
 0x123   :  { %v1042_v56 = vrot.slane %v952_v14, 2  ;;  %v1041_v5 = vrot.slane %v950_v62, 2  ;;  %v721_v33 = vadd.f32 %v593_v51, %v206_v59  ;;  %v143_v28 = vmul.f32 %v2657_v8, %v3205_v61 }
 0x124   :  { %2168 = vmatprep.mubr.f32.mxu0 %v1748_v0  ;;  %2571 = vmatprep.mubr.msk.f32.mxu1 %vm2027_vm3, %v1749_v22  ;;  %v209_v34 = vadd.f32 %v3216_v13, %v144_v37  ;;  %v146_v6 = vmul.f32 %v2658_v42, %v3205_v61 }
 0x125   :  { %v1107_v2 = vsel %vm1069_vm2, %v952_v14, %v1042_v56  ;;  %v1106_v57 = vsel %vm1069_vm2, %v950_v62, %v1041_v5  ;;  %2169 = vmatmul.mubr.f32.gmra.mrb[16].mxu0 %v1747_v45  ;;  %v208_v54 = vadd.f32 %v3216_v13, %v143_v28  ;;  %v2659_v14 = vld [vmem:[%s3979_s0 + $0xfc] sm:$0x3f] }
 0x126   :  { %v1235_v53 = vadd.f32 %v1107_v2, %v720_v1  ;;  %v1234_v60 = vadd.f32 %v1106_v57, %v719_v47  ;;  %v956_v44 = vpop.permute.xlu1 %955  ;;  %v954_v17 = vpop.permute.xlu0 %953  ;;  %v145_v62 = vmul.f32 %v2659_v14, %v3205_v61  ;;  %v211_v57 = vadd.f32 %v3216_v13, %v146_v6 }
 0x127   :  { %v1044_v18 = vrot.slane %v956_v44, 2  ;;  %v1043_v23 = vrot.slane %v954_v17, 2 }
 0x128   :  { %v1299_v9 = vmax.f32 %v1235_v53, 0.0  ;;  %v1298_v16 = vmax.f32 %v1234_v60, 0.0 }
 0x129   :  { %v1109_v19 = vsel %vm1069_vm2, %v956_v44, %v1044_v18  ;;  %v1108_v24 = vsel %vm1069_vm2, %v954_v17, %v1043_v23  ;;  %v210_v23 = vadd.f32 %v3216_v13, %v145_v62 }
 0x12a   :  { %v1237_v15 = vadd.f32 %v1109_v19, %v722_v11  ;;  %v1236_v20 = vadd.f32 %v1108_v24, %v721_v33  ;;  %v445_v63 = vpop.permute.xlu1 %444  ;;  %v443_v21 = vpop.permute.xlu0 %442  ;;  %v1750_v30 = vcombine.low %v1298_v16, %v1299_v9  ;;  %v1751_v38 = vcombine.high %v1298_v16, %v1299_v9 }
 0x12b   :  { %v531_v25 = vrot.slane %v445_v63, 2  ;;  %v530_v40 = vrot.slane %v443_v21, 2 }
 0x12c   :  { %v1301_v32 = vmax.f32 %v1237_v15, 0.0  ;;  %v1300_v3 = vmax.f32 %v1236_v20, 0.0  ;;  %v1767_v0 = vrot.slane %v1751_v38, %v3270_v58  ;;  %v1760_v35 = vrot.slane %v1750_v30, %v3270_v58 }
 0x12d   :  { %v596_v5 = vsel %vm554_vm1, %v445_v63, %v531_v25  ;;  %v595_v45 = vsel %vm554_vm1, %v443_v21, %v530_v40 }
 0x12e   :  { %v1752_v12 = vcombine.low %v1300_v3, %v1301_v32  ;;  %v1753_v7 = vcombine.high %v1300_v3, %v1301_v32  ;;  %v449_v26 = vpop.permute.xlu1 %448  ;;  %v447_v50 = vpop.permute.xlu0 %446  ;;  %v724_v17 = vadd.f32 %v596_v5, %v209_v34  ;;  %v723_v18 = vadd.f32 %v595_v45, %v208_v54 }
 0x12f   :  { %v533_v1 = vrot.slane %v449_v26, 2  ;;  %v532_v47 = vrot.slane %v447_v50, 2 }
 0x130   :  { %v1781_v22 = vrot.slane %v1753_v7, %v3270_v58  ;;  %v1774_v56 = vrot.slane %v1752_v12, %v3270_v58  ;;  %v2660_v12 = vld [vmem:[%s3979_s0 + $0x10e] sm:$0x3f] }
 0x131   :  { %v598_v11 = vsel %vm554_vm1, %v449_v26, %v533_v1  ;;  %v597_v33 = vsel %vm554_vm1, %v447_v50, %v532_v47  ;;  %v148_v7 = vmul.f32 %v2660_v12, %v3205_v61  ;;  %v2661_v26 = vld [vmem:[%s3979_s0 + $0x108] sm:$0x3f]  ;;  %v2662_v1 = vld [vmem:[%s3979_s0 + $0x11a] sm:$0x3f] }
 0x132   :  { %v960_v59 = vpop.permute.xlu1 %959  ;;  %v958_v48 = vpop.permute.xlu0 %957  ;;  %v1783_v51 = vcombine.high %v1760_v35, %v1774_v56  ;;  %v1784_v2 = vcombine.low %v1767_v0, %v1781_v22  ;;  %v1782_v44 = vcombine.low %v1760_v35, %v1774_v56  ;;  %v726_v10 = vadd.f32 %v598_v11, %v211_v57 }
 0x133   :  { %v1046_v53 = vrot.slane %v960_v59, 2  ;;  %v1045_v60 = vrot.slane %v958_v48, 2  ;;  %v725_v37 = vadd.f32 %v597_v33, %v210_v23  ;;  %v147_v50 = vmul.f32 %v2661_v26, %v3205_v61 }
 0x134   :  { %2173 = vmatprep.mubr.f32.mxu0 %v1783_v51  ;;  %2572 = vmatmul.mubr.msk.f32.gmra.mrb[8].mxu1 %vm2027_vm3, %v1784_v2  ;;  %v213_v5 = vadd.f32 %v3216_v13, %v148_v7  ;;  %v150_v47 = vmul.f32 %v2662_v1, %v3205_v61 }
 0x135   :  { %v1111_v9 = vsel %vm1069_vm2, %v960_v59, %v1046_v53  ;;  %v1110_v16 = vsel %vm1069_vm2, %v958_v48, %v1045_v60  ;;  %2174 = vmatmul.mubr.f32.gmra.mrb[18].mxu0 %v1782_v44  ;;  %v212_v45 = vadd.f32 %v3216_v13, %v147_v50  ;;  %v2663_v59 = vld [vmem:[%s3979_s0 + $0x114] sm:$0x3f] }
 0x136   :  { %v1239_v19 = vadd.f32 %v1111_v9, %v724_v17  ;;  %v1238_v24 = vadd.f32 %v1110_v16, %v723_v18  ;;  %v964_v15 = vpop.permute.xlu1 %963  ;;  %v962_v20 = vpop.permute.xlu0 %961  ;;  %v149_v48 = vmul.f32 %v2663_v59, %v3205_v61  ;;  %v215_v16 = vadd.f32 %v3216_v13, %v150_v47 }
 0x137   :  { %v1048_v63 = vrot.slane %v964_v15, 2  ;;  %v1047_v21 = vrot.slane %v962_v20, 2 }
 0x138   :  { %v1303_v8 = vmax.f32 %v1239_v19, 0.0  ;;  %v1302_v28 = vmax.f32 %v1238_v24, 0.0 }
 0x139   :  { %v1113_v30 = vsel %vm1069_vm2, %v964_v15, %v1048_v63  ;;  %v1112_v38 = vsel %vm1069_vm2, %v962_v20, %v1047_v21  ;;  %v214_v21 = vadd.f32 %v3216_v13, %v149_v48 }
 0x13a   :  { %v1241_v32 = vadd.f32 %v1113_v30, %v726_v10  ;;  %v1240_v3 = vadd.f32 %v1112_v38, %v725_v37  ;;  %v453_v25 = vpop.permute.xlu1 %452  ;;  %v451_v40 = vpop.permute.xlu0 %450  ;;  %v1785_v34 = vcombine.low %v1302_v28, %v1303_v8  ;;  %v1786_v54 = vcombine.high %v1302_v28, %v1303_v8 }
 0x13b   :  { %v535_v14 = vrot.slane %v453_v25, 2  ;;  %v534_v62 = vrot.slane %v451_v40, 2 }
 0x13c   :  { %v1305_v42 = vmax.f32 %v1241_v32, 0.0  ;;  %v1304_v6 = vmax.f32 %v1240_v3, 0.0  ;;  %v1802_v51 = vrot.slane %v1786_v54, %v3270_v58  ;;  %v1795_v57 = vrot.slane %v1785_v34, %v3270_v58 }
 0x13d   :  { %v600_v60 = vsel %vm554_vm1, %v453_v25, %v535_v14  ;;  %v599_v44 = vsel %vm554_vm1, %v451_v40, %v534_v62 }
 0x13e   :  { %v1787_v0 = vcombine.low %v1304_v6, %v1305_v42  ;;  %v1788_v22 = vcombine.high %v1304_v6, %v1305_v42  ;;  %v457_v35 = vpop.permute.xlu1 %456  ;;  %v455_v56 = vpop.permute.xlu0 %454  ;;  %v728_v20 = vadd.f32 %v600_v60, %v213_v5  ;;  %v727_v63 = vadd.f32 %v599_v44, %v212_v45 }
 0x13f   :  { %v537_v17 = vrot.slane %v457_v35, 2  ;;  %v536_v18 = vrot.slane %v455_v56, 2 }
 0x140   :  { %v1816_v2 = vrot.slane %v1788_v22, %v3270_v58  ;;  %v1809_v53 = vrot.slane %v1787_v0, %v3270_v58  ;;  %v2664_v0 = vld [vmem:[%s3979_s0 + $0x126] sm:$0x3f] }
 0x141   :  { %v602_v10 = vsel %vm554_vm1, %v457_v35, %v537_v17  ;;  %v601_v37 = vsel %vm554_vm1, %v455_v56, %v536_v18  ;;  %v152_v22 = vmul.f32 %v2664_v0, %v3205_v61  ;;  %v2665_v35 = vld [vmem:[%s3979_s0 + $0x120] sm:$0x3f]  ;;  %v2666_v17 = vld [vmem:[%s3979_s0 + $0x132] sm:$0x3f] }
 0x142   :  { %v968_v23 = vpop.permute.xlu1 %967  ;;  %v966_v11 = vpop.permute.xlu0 %965  ;;  %v1818_v33 = vcombine.high %v1795_v57, %v1809_v53  ;;  %v1819_v9 = vcombine.low %v1802_v51, %v1816_v2  ;;  %v1817_v15 = vcombine.low %v1795_v57, %v1809_v53  ;;  %v730_v12 = vadd.f32 %v602_v10, %v215_v16 }
 0x143   :  { %v1050_v19 = vrot.slane %v968_v23, 2  ;;  %v1049_v24 = vrot.slane %v966_v11, 2  ;;  %v729_v7 = vadd.f32 %v601_v37, %v214_v21  ;;  %v151_v56 = vmul.f32 %v2665_v35, %v3205_v61 }
 0x144   :  { %2178 = vmatprep.mubr.f32.mxu0 %v1818_v33  ;;  %2574 = vmatprep.mubr.msk.f32.mxu1 %vm2027_vm3, %v1819_v9  ;;  %v217_v60 = vadd.f32 %v3216_v13, %v152_v22  ;;  %v154_v18 = vmul.f32 %v2666_v17, %v3205_v61 }
 0x145   :  { %v1115_v8 = vsel %vm1069_vm2, %v968_v23, %v1050_v19  ;;  %v1114_v28 = vsel %vm1069_vm2, %v966_v11, %v1049_v24  ;;  %2179 = vmatmul.mubr.f32.gmra.mrb[20].mxu0 %v1817_v15  ;;  %v216_v44 = vadd.f32 %v3216_v13, %v151_v56  ;;  %v2667_v23 = vld [vmem:[%s3979_s0 + $0x12c] sm:$0x3f] }
 0x146   :  { %v1243_v30 = vadd.f32 %v1115_v8, %v728_v20  ;;  %v1242_v38 = vadd.f32 %v1114_v28, %v727_v63  ;;  %v972_v32 = vpop.permute.xlu1 %971  ;;  %v970_v3 = vpop.permute.xlu0 %969  ;;  %v153_v11 = vmul.f32 %v2667_v23, %v3205_v61  ;;  %v219_v28 = vadd.f32 %v3216_v13, %v154_v18 }
 0x147   :  { %v1052_v25 = vrot.slane %v972_v32, 2  ;;  %v1051_v40 = vrot.slane %v970_v3, 2 }
 0x148   :  { %v1307_v26 = vmax.f32 %v1243_v30, 0.0  ;;  %v1306_v50 = vmax.f32 %v1242_v38, 0.0 }
 0x149   :  { %v1117_v34 = vsel %vm1069_vm2, %v972_v32, %v1052_v25  ;;  %v1116_v54 = vsel %vm1069_vm2, %v970_v3, %v1051_v40  ;;  %v218_v40 = vadd.f32 %v3216_v13, %v153_v11 }
 0x14a   :  { %v1245_v42 = vadd.f32 %v1117_v34, %v730_v12  ;;  %v1244_v6 = vadd.f32 %v1116_v54, %v729_v7  ;;  %v461_v14 = vpop.permute.xlu1 %460  ;;  %v459_v62 = vpop.permute.xlu0 %458  ;;  %v1820_v5 = vcombine.low %v1306_v50, %v1307_v26  ;;  %v1821_v45 = vcombine.high %v1306_v50, %v1307_v26 }
 0x14b   :  { %v539_v59 = vrot.slane %v461_v14, 2  ;;  %v538_v48 = vrot.slane %v459_v62, 2 }
 0x14c   :  { %v1309_v1 = vmax.f32 %v1245_v42, 0.0  ;;  %v1308_v47 = vmax.f32 %v1244_v6, 0.0  ;;  %v1837_v33 = vrot.slane %v1821_v45, %v3270_v58  ;;  %v1830_v16 = vrot.slane %v1820_v5, %v3270_v58 }
 0x14d   :  { %v604_v24 = vsel %vm554_vm1, %v461_v14, %v539_v59  ;;  %v603_v15 = vsel %vm554_vm1, %v459_v62, %v538_v48 }
 0x14e   :  { %v1822_v51 = vcombine.low %v1308_v47, %v1309_v1  ;;  %v1823_v2 = vcombine.high %v1308_v47, %v1309_v1  ;;  %v465_v57 = vpop.permute.xlu1 %464  ;;  %v463_v53 = vpop.permute.xlu0 %462  ;;  %v732_v3 = vadd.f32 %v604_v24, %v217_v60  ;;  %v731_v25 = vadd.f32 %v603_v15, %v216_v44 }
 0x14f   :  { %v541_v20 = vrot.slane %v465_v57, 2  ;;  %v540_v63 = vrot.slane %v463_v53, 2 }
 0x150   :  { %v1851_v9 = vrot.slane %v1823_v2, %v3270_v58  ;;  %v1844_v19 = vrot.slane %v1822_v51, %v3270_v58  ;;  %v156_v51 = vmul.f32 %v3205_v61, %v3514_v29  ;;  %v155_v2 = vmul.f32 %v3205_v61, %v3524_v49 }
 0x151   :  { %v606_v12 = vsel %vm554_vm1, %v465_v57, %v541_v20  ;;  %v605_v7 = vsel %vm554_vm1, %v463_v53, %v540_v63  ;;  %v158_v29 = vmul.f32 %v3205_v61, %v3540_v31  ;;  %v157_v49 = vmul.f32 %v3205_v61, %v3545_v46 }
 0x152   :  { %v976_v21 = vpop.permute.xlu1 %975  ;;  %v974_v10 = vpop.permute.xlu0 %973  ;;  %v1853_v37 = vcombine.high %v1830_v16, %v1844_v19  ;;  %v1854_v8 = vcombine.low %v1837_v33, %v1851_v9  ;;  %v1852_v32 = vcombine.low %v1830_v16, %v1844_v19  ;;  %v734_v0 = vadd.f32 %v606_v12, %v219_v28 }
 0x153   :  { %v1054_v30 = vrot.slane %v976_v21, 2  ;;  %v1053_v38 = vrot.slane %v974_v10, 2  ;;  %v733_v22 = vadd.f32 %v605_v7, %v218_v40  ;;  %v221_v16 = vadd.f32 %v3216_v13, %v156_v51 }
 0x154   :  { %2183 = vmatprep.mubr.f32.mxu0 %v1853_v37  ;;  %2575 = vmatmul.mubr.msk.f32.gmra.mrb[10].mxu1 %vm2027_vm3, %v1854_v8  ;;  %v220_v19 = vadd.f32 %v3216_v13, %v155_v2  ;;  %v223_v46 = vadd.f32 %v3216_v13, %v158_v29  ;;  %v222_v7 = vadd.f32 %v3216_v13, %v157_v49 }
 0x155   :  { %v1119_v26 = vsel %vm1069_vm2, %v976_v21, %v1054_v30  ;;  %v1118_v50 = vsel %vm1069_vm2, %v974_v10, %v1053_v38  ;;  %2184 = vmatmul.mubr.f32.gmra.mrb[22].mxu0 %v1852_v32 }
 0x156   :  { %v1247_v34 = vadd.f32 %v1119_v26, %v732_v3  ;;  %v1246_v54 = vadd.f32 %v1118_v50, %v731_v25  ;;  %v980_v42 = vpop.permute.xlu1 %979  ;;  %v978_v6 = vpop.permute.xlu0 %977 }
 0x157   :  { %v1056_v14 = vrot.slane %v980_v42, 2  ;;  %v1055_v62 = vrot.slane %v978_v6, 2 }
 0x158   :  { %v1311_v35 = vmax.f32 %v1247_v34, 0.0  ;;  %v1310_v56 = vmax.f32 %v1246_v54, 0.0 }
 0x159   :  { %v1121_v5 = vsel %vm1069_vm2, %v980_v42, %v1056_v14  ;;  %v1120_v45 = vsel %vm1069_vm2, %v978_v6, %v1055_v62 }
 0x15a   :  { %v1249_v1 = vadd.f32 %v1121_v5, %v734_v0  ;;  %v1248_v47 = vadd.f32 %v1120_v45, %v733_v22  ;;  %v469_v59 = vpop.permute.xlu1 %468  ;;  %v467_v48 = vpop.permute.xlu0 %466  ;;  %v1855_v57 = vcombine.low %v1310_v56, %v1311_v35  ;;  %v1856_v53 = vcombine.high %v1310_v56, %v1311_v35 }
 0x15b   :  { %v543_v17 = vrot.slane %v469_v59, 2  ;;  %v542_v18 = vrot.slane %v467_v48, 2 }
 0x15c   :  { %v1313_v60 = vmax.f32 %v1249_v1, 0.0  ;;  %v1312_v44 = vmax.f32 %v1248_v47, 0.0  ;;  %v1872_v24 = vrot.slane %v1856_v53, %v3270_v58  ;;  %v1865_v20 = vrot.slane %v1855_v57, %v3270_v58 }
 0x15d   :  { %v608_v21 = vsel %vm554_vm1, %v469_v59, %v543_v17  ;;  %v607_v10 = vsel %vm554_vm1, %v467_v48, %v542_v18  ;;  %v160_v57 = vmul.f32 %v3205_v61, %v3583_v41  ;;  %v159_v53 = vmul.f32 %v3205_v61, %v3593_v39 }
 0x15e   :  { %v1857_v23 = vcombine.low %v1312_v44, %v1313_v60  ;;  %v1858_v11 = vcombine.high %v1312_v44, %v1313_v60  ;;  %v473_v33 = vpop.permute.xlu1 %472  ;;  %v471_v9 = vpop.permute.xlu0 %470  ;;  %v736_v40 = vadd.f32 %v608_v21, %v221_v16  ;;  %v735_v12 = vadd.f32 %v607_v10, %v220_v19 }
 0x15f   :  { %v545_v37 = vrot.slane %v473_v33, 2  ;;  %v544_v8 = vrot.slane %v471_v9, 2  ;;  %v225_v29 = vadd.f32 %v3216_v13, %v160_v57  ;;  %v224_v49 = vadd.f32 %v3216_v13, %v159_v53 }
 0x160   :  { %v1886_v15 = vrot.slane %v1858_v11, %v3270_v58  ;;  %v1879_v63 = vrot.slane %v1857_v23, %v3270_v58  ;;  %v162_v41 = vmul.f32 %v3205_v61, %v3609_v43  ;;  %v161_v39 = vmul.f32 %v3205_v61, %v3614_v55 }
 0x161   :  { %v610_v26 = vsel %vm554_vm1, %v473_v33, %v545_v37  ;;  %v609_v50 = vsel %vm554_vm1, %v471_v9, %v544_v8  ;;  %v164_v57 = vmul.f32 %v3205_v61, %v3660_v52 }
 0x162   :  { %v984_v28 = vpop.permute.xlu1 %983  ;;  %v982_v30 = vpop.permute.xlu0 %981  ;;  %v1888_v31 = vcombine.high %v1865_v20, %v1879_v63  ;;  %v1889_v38 = vcombine.low %v1872_v24, %v1886_v15  ;;  %v1887_v25 = vcombine.low %v1865_v20, %v1879_v63  ;;  %v738_v35 = vadd.f32 %v610_v26, %v223_v46 }
 0x163   :  { %v1058_v32 = vrot.slane %v984_v28, 2  ;;  %v1057_v3 = vrot.slane %v982_v30, 2  ;;  %v737_v56 = vadd.f32 %v609_v50, %v222_v7  ;;  %v227_v55 = vadd.f32 %v3216_v13, %v162_v41 }
 0x164   :  { %2188 = vmatprep.mubr.f32.mxu0 %v1888_v31  ;;  %2577 = vmatprep.mubr.msk.f32.mxu1 %vm2027_vm3, %v1889_v38 }
 0x165   :  { %v1123_v34 = vsel %vm1069_vm2, %v984_v28, %v1058_v32  ;;  %v1122_v54 = vsel %vm1069_vm2, %v982_v30, %v1057_v3  ;;  %2189 = vmatmul.mubr.f32.gmra.mrb[24].mxu0 %v1887_v25 }
 0x166   :  { %v1251_v42 = vadd.f32 %v1123_v34, %v736_v40  ;;  %v1250_v6 = vadd.f32 %v1122_v54, %v735_v12  ;;  %v988_v14 = vpop.permute.xlu1 %987  ;;  %v986_v62 = vpop.permute.xlu0 %985  ;;  %v226_v40 = vadd.f32 %v3216_v13, %v161_v39 }
 0x167   :  { %v1060_v0 = vrot.slane %v988_v14, 2  ;;  %v1059_v22 = vrot.slane %v986_v62, 2 }
 0x168   :  { %v1315_v5 = vmax.f32 %v1251_v42, 0.0  ;;  %v1314_v45 = vmax.f32 %v1250_v6, 0.0 }
 0x169   :  { %v1125_v1 = vsel %vm1069_vm2, %v988_v14, %v1060_v0  ;;  %v1124_v47 = vsel %vm1069_vm2, %v986_v62, %v1059_v22 }
 0x16a   :  { %v1253_v59 = vadd.f32 %v1125_v1, %v738_v35  ;;  %v1252_v48 = vadd.f32 %v1124_v47, %v737_v56  ;;  %v477_v51 = vpop.permute.xlu1 %476  ;;  %v475_v2 = vpop.permute.xlu0 %474  ;;  %v1890_v60 = vcombine.low %v1314_v45, %v1315_v5  ;;  %v1891_v44 = vcombine.high %v1314_v45, %v1315_v5 }
 0x16b   :  { %v547_v23 = vrot.slane %v477_v51, 2  ;;  %v546_v11 = vrot.slane %v475_v2, 2 }
 0x16c   :  { %v1317_v17 = vmax.f32 %v1253_v59, 0.0  ;;  %v1316_v18 = vmax.f32 %v1252_v48, 0.0  ;;  %v1907_v24 = vrot.slane %v1891_v44, %v3270_v58  ;;  %v1900_v20 = vrot.slane %v1890_v60, %v3270_v58 }
 0x16d   :  { %v612_v21 = vsel %vm554_vm1, %v477_v51, %v547_v23  ;;  %v611_v10 = vsel %vm554_vm1, %v475_v2, %v546_v11  ;;  %v163_v11 = vmul.f32 %v3205_v61, %v3670_v36 }
 0x16e   :  { %v1892_v33 = vcombine.low %v1316_v18, %v1317_v17  ;;  %v1893_v9 = vcombine.high %v1316_v18, %v1317_v17  ;;  %v481_v16 = vpop.permute.xlu1 %480  ;;  %v479_v19 = vpop.permute.xlu0 %478  ;;  %v740_v3 = vadd.f32 %v612_v21, %v225_v29  ;;  %v739_v25 = vadd.f32 %v611_v10, %v224_v49 }
 0x16f   :  { %v549_v37 = vrot.slane %v481_v16, 2  ;;  %v548_v8 = vrot.slane %v479_v19, 2  ;;  %v229_v29 = vadd.f32 %v3216_v13, %v164_v57  ;;  %v166_v49 = vmul.f32 %v3205_v61, %v3686_v4 }
 0x170   :  { %v1921_v15 = vrot.slane %v1893_v9, %v3270_v58  ;;  %v1914_v63 = vrot.slane %v1892_v33, %v3270_v58  ;;  %v165_v21 = vmul.f32 %v3205_v61, %v3691_v27 }
 0x171   :  { %v614_v12 = vsel %vm554_vm1, %v481_v16, %v549_v37  ;;  %v613_v7 = vsel %vm554_vm1, %v479_v19, %v548_v8 }
 0x172   :  { %v992_v28 = vpop.permute.xlu1 %991  ;;  %v990_v30 = vpop.permute.xlu0 %989  ;;  %v1923_v43 = vcombine.high %v1900_v20, %v1914_v63  ;;  %v1924_v31 = vcombine.low %v1907_v24, %v1921_v15  ;;  %v1922_v32 = vcombine.low %v1900_v20, %v1914_v63  ;;  %v742_v0 = vadd.f32 %v614_v12, %v227_v55 }
 0x173   :  { %v1062_v38 = vrot.slane %v992_v28, 2  ;;  %v1061_v46 = vrot.slane %v990_v30, 2  ;;  %v741_v22 = vadd.f32 %v613_v7, %v226_v40  ;;  %v228_v20 = vadd.f32 %v3216_v13, %v163_v11 }
 0x174   :  { %2193 = vmatprep.mubr.f32.mxu0 %v1923_v43  ;;  %2578 = vmatmul.mubr.msk.f32.gmra.mrb[12].mxu1 %vm2027_vm3, %v1924_v31  ;;  %v230_v61 = vadd.f32 %v3216_v13, %v165_v21 }
 0x175   :  { %v1127_v26 = vsel %vm1069_vm2, %v992_v28, %v1062_v38  ;;  %v1126_v50 = vsel %vm1069_vm2, %v990_v30, %v1061_v46  ;;  %2194 = vmatmul.mubr.f32.gmra.mrb[26].mxu0 %v1922_v32  ;;  %v231_v38 = vadd.f32 %v3216_v13, %v166_v49 }
 0x176   :  { %v1255_v34 = vadd.f32 %v1127_v26, %v740_v3  ;;  %v1254_v54 = vadd.f32 %v1126_v50, %v739_v25  ;;  %v996_v42 = vpop.permute.xlu1 %995  ;;  %v994_v6 = vpop.permute.xlu0 %993 }
 0x177   :  { %v1064_v14 = vrot.slane %v996_v42, 2  ;;  %v1063_v62 = vrot.slane %v994_v6, 2 }
 0x178   :  { %v1319_v35 = vmax.f32 %v1255_v34, 0.0  ;;  %v1318_v56 = vmax.f32 %v1254_v54, 0.0 }
 0x179   :  { %v1129_v5 = vsel %vm1069_vm2, %v996_v42, %v1064_v14  ;;  %v1128_v45 = vsel %vm1069_vm2, %v994_v6, %v1063_v62  ;;  %v2456_v1 = vpop.f32.mrb[0].mxu0 }
 0x17a   :  { %v1257_v47 = vadd.f32 %v1129_v5, %v742_v0  ;;  %v1256_v59 = vadd.f32 %v1128_v45, %v741_v22  ;;  %v2457_v48 = vpop.f32.mrb[1].mxu0  ;;  %v485_v51 = vpop.permute.xlu1 %484  ;;  %v1925_v60 = vcombine.low %v1318_v56, %v1319_v35  ;;  %v1926_v44 = vcombine.high %v1318_v56, %v1319_v35 }
 0x17b   :  { %v2458_v2 = vadd.f32 %v2457_v48, %v2456_v1  ;;  %v483_v53 = vpop.permute.xlu0 %482  ;;  %v551_v23 = vrot.slane %v485_v51, 2 }
 0x17c   :  { %v1321_v17 = vmax.f32 %v1257_v47, 0.0  ;;  %v1320_v18 = vmax.f32 %v1256_v59, 0.0  ;;  %v550_v16 = vrot.slane %v483_v53, 2  ;;  %v1942_v52 = vrot.slane %v1926_v44, %v3270_v58 }
 0x17d   :  { %v1935_v24 = vrot.slane %v1925_v60, %v3270_v58  ;;  %v616_v36 = vsel %vm554_vm1, %v485_v51, %v551_v23 }
 0x17e   :  { %v1927_v33 = vcombine.low %v1320_v18, %v1321_v17  ;;  %v1928_v9 = vcombine.high %v1320_v18, %v1321_v17  ;;  %v489_v19 = vpop.permute.xlu1 %488  ;;  %v615_v10 = vsel %vm554_vm1, %v483_v53, %v550_v16  ;;  %v744_v55 = vadd.f32 %v616_v36, %v229_v29 }
 0x17f   :  { %v487_v41 = vpop.permute.xlu0 %486  ;;  %v553_v63 = vrot.slane %v489_v19, 2  ;;  %v743_v32 = vadd.f32 %v615_v10, %v228_v20 }
 0x180   :  { %v1956_v39 = vrot.slane %v1928_v9, %v3270_v58  ;;  %v1949_v15 = vrot.slane %v1927_v33, %v3270_v58  ;;  %v552_v4 = vrot.slane %v487_v41, 2 }
 0x181   :  { %v618_v3 = vsel %vm554_vm1, %v489_v19, %v553_v63 }
 0x182   :  { %v1000_v37 = vpop.permute.xlu1 %999  ;;  %v1958_v8 = vcombine.high %v1935_v24, %v1949_v15  ;;  %v1959_v28 = vcombine.low %v1942_v52, %v1956_v39  ;;  %v1957_v31 = vcombine.low %v1935_v24, %v1949_v15  ;;  %v617_v25 = vsel %vm554_vm1, %v487_v41, %v552_v4 }
 0x183   :  { %v1066_v30 = vrot.slane %v1000_v37, 2  ;;  %v998_v43 = vpop.permute.xlu0 %997  ;;  %v746_v54 = vadd.f32 %v618_v3, %v231_v38  ;;  %v745_v14 = vadd.f32 %v617_v25, %v230_v61 }
 0x184   :  { %v1065_v46 = vrot.slane %v998_v43, 2  ;;  %2198 = vmatprep.mubr.f32.mxu0 %v1958_v8  ;;  %2580 = vmatprep.mubr.msk.f32.mxu1 %vm2027_vm3, %v1959_v28 }
 0x185   :  { %v1131_v27 = vsel %vm1069_vm2, %v1000_v37, %v1066_v30  ;;  %2199 = vmatmul.mubr.f32.gmra.mrb[28].mxu0 %v1957_v31 }
 0x186   :  { %v1259_v40 = vadd.f32 %v1131_v27, %v744_v55  ;;  %v1130_v12 = vsel %vm1069_vm2, %v998_v43, %v1065_v46  ;;  %v1004_v7 = vpop.permute.xlu1 %1003 }
 0x187   :  { %v1258_v26 = vadd.f32 %v1130_v12, %v743_v32  ;;  %v1068_v50 = vrot.slane %v1004_v7, 2  ;;  %v1002_v34 = vpop.permute.xlu0 %1001 }
 0x188   :  { %v1067_v42 = vrot.slane %v1002_v34, 2  ;;  %v2561_v6 = vpop.f32.mrb[0].mxu1  ;;  %v1323_v62 = vmax.f32 %v1259_v40, 0.0 }
 0x189   :  { %v1322_v0 = vmax.f32 %v1258_v26, 0.0  ;;  %v1133_v13 = vsel %vm1069_vm2, %v1004_v7, %v1068_v50  ;;  %v2459_v22 = vpop.f32.mrb[2].mxu0  ;;  %v2275_v35 = vpop.f32.mrb[1].mxu1 }
 0x18a   :  { %v1261_v56 = vadd.f32 %v1133_v13, %v746_v54  ;;  %v1132_v5 = vsel %vm1069_vm2, %v1002_v34, %v1067_v42  ;;  %v2276_v45 = vadd.f32 %v2458_v2, %v2275_v35  ;;  %v2460_v1 = vpop.f32.mrb[3].mxu0 }
 0x18b   :  { %v1260_v47 = vadd.f32 %v1132_v5, %v745_v14  ;;  %v2461_v59 = vadd.f32 %v2460_v1, %v2459_v22  ;;  %v1960_v51 = vcombine.low %v1322_v0, %v1323_v62  ;;  %v1961_v57 = vcombine.high %v1322_v0, %v1323_v62 }
 0x18c   :  { %v1325_v48 = vmax.f32 %v1261_v56, 0.0  ;;  %2354 = vxpose.xlu0.b32.start [1/16] (narrow) %v2276_v45, 8 }
 0x18d   :  { %v1324_v53 = vmax.f32 %v1260_v47, 0.0  ;;  %v2281_v60 = vadd.f32 %v2561_v6, %v2461_v59  ;;  %v1977_v18 = vrot.slane %v1961_v57, %v3270_v58  ;;  %v1970_v11 = vrot.slane %v1960_v51, %v3270_v58 }
 0x18f   :  { %v1962_v44 = vcombine.low %v1324_v53, %v1325_v48  ;;  %v1963_v17 = vcombine.high %v1324_v53, %v1325_v48 }
 0x190   :  { %2355 = vxpose.xlu0.b32.cont [2/16] (narrow) %v2281_v60, 8 }
 0x191   :  { %v1991_v23 = vrot.slane %v1963_v17, %v3270_v58  ;;  %v1984_v2 = vrot.slane %v1962_v44, %v3270_v58 }
 0x193   :  { %v1993_v33 = vcombine.high %v1970_v11, %v1984_v2  ;;  %v1994_v9 = vcombine.low %v1977_v18, %v1991_v23  ;;  %v1992_v16 = vcombine.low %v1970_v11, %v1984_v2 }
 0x195   :  { %2203 = vmatprep.mubr.f32.mxu0 %v1993_v33  ;;  %2581 = vmatmul.mubr.msk.f32.gmra.mrb[14].mxu1 %vm2027_vm3, %v1994_v9 }
 0x196   :  { %2204 = vmatmul.mubr.f32.gmra.mrb[30].mxu0 %v1992_v16 }
 0x199   :  { %v2462_v19 = vpop.f32.mrb[4].mxu0 }
 0x19a   :  { %v2463_v29 = vpop.f32.mrb[5].mxu0 }
 0x19b   :  { %v2464_v49 = vadd.f32 %v2463_v29, %v2462_v19 }
 0x1a8   :  { %v2564_v41 = vpop.f32.mrb[2].mxu1 }
 0x1a9   :  { %v2465_v52 = vpop.f32.mrb[6].mxu0  ;;  %v2285_v39 = vpop.f32.mrb[3].mxu1 }
 0x1aa   :  { %v2286_v24 = vadd.f32 %v2464_v49, %v2285_v39  ;;  %v2466_v15 = vpop.f32.mrb[7].mxu0 }
 0x1ab   :  { %v2467_v36 = vadd.f32 %v2466_v15, %v2465_v52 }
 0x1ac   :  { %2356 = vxpose.xlu0.b32.cont [3/16] (narrow) %v2286_v24, 8  ;;  %v2387_v24 = vstv %s3983_s4 }
 0x1ad   :  { %v2291_v20 = vadd.f32 %v2564_v41, %v2467_v36 }
 0x1b0   :  { %2357 = vxpose.xlu0.b32.cont [4/16] (narrow) %v2291_v20, 8 }
 0x1b9   :  { %v2468_v58 = vpop.f32.mrb[8].mxu0 }
 0x1ba   :  { %v2469_v63 = vpop.f32.mrb[9].mxu0 }
 0x1bb   :  { %v2470_v21 = vadd.f32 %v2469_v63, %v2468_v58 }
 0x1c8   :  { %v2567_v10 = vpop.f32.mrb[4].mxu1 }
 0x1c9   :  { %v2471_v4 = vpop.f32.mrb[10].mxu0  ;;  %v2295_v37 = vpop.f32.mrb[5].mxu1 }
 0x1ca   :  { %v2296_v8 = vadd.f32 %v2470_v21, %v2295_v37  ;;  %v2472_v28 = vpop.f32.mrb[11].mxu0 }
 0x1cb   :  { %v2473_v30 = vadd.f32 %v2472_v28, %v2471_v4 }
 0x1cc   :  { %2358 = vxpose.xlu0.b32.cont [5/16] (narrow) %v2296_v8, 8 }
 0x1cd   :  { %v2301_v43 = vadd.f32 %v2567_v10, %v2473_v30 }
 0x1d0   :  { %2359 = vxpose.xlu0.b32.cont [6/16] (narrow) %v2301_v43, 8 }
 0x1d9   :  { %v2474_v31 = vpop.f32.mrb[12].mxu0 }
 0x1da   :  { %v2475_v55 = vpop.f32.mrb[13].mxu0 }
 0x1db   :  { %v2476_v38 = vadd.f32 %v2475_v55, %v2474_v31 }
 0x1e8   :  { %v2570_v46 = vpop.f32.mrb[6].mxu1 }
 0x1e9   :  { %v2477_v32 = vpop.f32.mrb[14].mxu0  ;;  %v2305_v3 = vpop.f32.mrb[7].mxu1 }
 0x1ea   :  { %v2306_v61 = vadd.f32 %v2476_v38, %v2305_v3  ;;  %v2478_v27 = vpop.f32.mrb[15].mxu0 }
 0x1eb   :  { %v2479_v25 = vadd.f32 %v2478_v27, %v2477_v32 }
 0x1ec   :  { %2360 = vxpose.xlu0.b32.cont [7/16] (narrow) %v2306_v61, 8 }
 0x1ed   :  { %v2311_v40 = vadd.f32 %v2570_v46, %v2479_v25 }
 0x1f0   :  { %2361 = vxpose.xlu0.b32.cont [8/16] (narrow) %v2311_v40, 8 }
 0x1f8   :  { %v2480_v12 = vpop.f32.mrb[16].mxu0 }
 0x1f9   :  { %v2481_v7 = vpop.f32.mrb[17].mxu0 }
 0x1fa   :  { %v2482_v26 = vadd.f32 %v2481_v7, %v2480_v12 }
 0x207   :  { %v2573_v50 = vpop.f32.mrb[8].mxu1 }
 0x208   :  { %v2483_v34 = vpop.f32.mrb[18].mxu0  ;;  %v2315_v54 = vpop.f32.mrb[9].mxu1 }
 0x209   :  { %v2316_v42 = vadd.f32 %v2482_v26, %v2315_v54  ;;  %v2484_v6 = vpop.f32.mrb[19].mxu0 }
 0x20a   :  { %v2485_v14 = vadd.f32 %v2484_v6, %v2483_v34 }
 0x20b   :  { %2362 = vxpose.xlu0.b32.cont [9/16] (narrow) %v2316_v42, 8 }
 0x20c   :  { %v2321_v62 = vadd.f32 %v2573_v50, %v2485_v14 }
 0x20f   :  { %2363 = vxpose.xlu0.b32.cont [10/16] (narrow) %v2321_v62, 8 }
 0x218   :  { %v2486_v0 = vpop.f32.mrb[20].mxu0 }
 0x219   :  { %v2487_v13 = vpop.f32.mrb[21].mxu0 }
 0x21a   :  { %v2488_v22 = vadd.f32 %v2487_v13, %v2486_v0 }
 0x227   :  { %v2576_v35 = vpop.f32.mrb[10].mxu1 }
 0x228   :  { %v2489_v56 = vpop.f32.mrb[22].mxu0  ;;  %v2325_v5 = vpop.f32.mrb[11].mxu1 }
 0x229   :  { %v2326_v45 = vadd.f32 %v2488_v22, %v2325_v5  ;;  %v2490_v1 = vpop.f32.mrb[23].mxu0 }
 0x22a   :  { %v2491_v47 = vadd.f32 %v2490_v1, %v2489_v56 }
 0x22b   :  { %2364 = vxpose.xlu0.b32.cont [11/16] (narrow) %v2326_v45, 8 }
 0x22c   :  { %v2331_v59 = vadd.f32 %v2576_v35, %v2491_v47 }
 0x22f   :  { %2365 = vxpose.xlu0.b32.cont [12/16] (narrow) %v2331_v59, 8 }
 0x238   :  { %v2492_v48 = vpop.f32.mrb[24].mxu0 }
 0x239   :  { %v2493_v51 = vpop.f32.mrb[25].mxu0 }
 0x23a   :  { %v2494_v57 = vadd.f32 %v2493_v51, %v2492_v48 }
 0x247   :  { %v2579_v53 = vpop.f32.mrb[12].mxu1 }
 0x248   :  { %v2495_v60 = vpop.f32.mrb[26].mxu0  ;;  %v2335_v44 = vpop.f32.mrb[13].mxu1 }
 0x249   :  { %v2336_v17 = vadd.f32 %v2494_v57, %v2335_v44  ;;  %v2496_v18 = vpop.f32.mrb[27].mxu0 }
 0x24a   :  { %v2497_v23 = vadd.f32 %v2496_v18, %v2495_v60 }
 0x24b   :  { %2366 = vxpose.xlu0.b32.cont [13/16] (narrow) %v2336_v17, 8 }
 0x24c   :  { %v2341_v11 = vadd.f32 %v2579_v53, %v2497_v23 }
 0x24f   :  { %2367 = vxpose.xlu0.b32.cont [14/16] (narrow) %v2341_v11, 8 }
 0x258   :  { %v2498_v2 = vpop.f32.mrb[28].mxu0 }
 0x259   :  { %v2499_v33 = vpop.f32.mrb[29].mxu0 }
 0x25a   :  { %v2500_v9 = vadd.f32 %v2499_v33, %v2498_v2 }
 0x268   :  { %v2582_v16 = vpop.f32.mrb[14].mxu1 }
 0x269   :  { %v2501_v19 = vpop.f32.mrb[30].mxu0  ;;  %v2345_v29 = vpop.f32.mrb[15].mxu1 }
 0x26a   :  { %v2346_v49 = vadd.f32 %v2500_v9, %v2345_v29  ;;  %v2502_v41 = vpop.f32.mrb[31].mxu0 }
 0x26b   :  { %v2503_v52 = vadd.f32 %v2502_v41, %v2501_v19 }
 0x26c   :  { %2368 = vxpose.xlu0.b32.cont [15/16] (narrow) %v2346_v49, 8 }
 0x26d   :  { %v2351_v39 = vadd.f32 %v2582_v16, %v2503_v52 }
 0x270   :  { %2369 = vxpose.xlu0.b32.end [16/16] (narrow) %v2351_v39, 8 }
 0x2b4   :  { %v2370_v15 = vpop.trf.xlu0 }
 0x2b5   :  { %v2388_v36 = vadd.f32 %v2387_v24, %v2370_v15 }
 0x2b7   :  { %2389 = vst [vmem:[#allocation7] sm:$0x1] %v2388_v36 }
 0x2b8   :  { %2691 = shalt.err (!%p2688_p9)
}
 0x2b9   :  { %s2692_s22 = scalar_lea.hbm %s3984_s5, 16 }
 0x2ba   :  { %p2693_p10 = scmp.ne.s32.totalorder %s3984_s5, %s2692_s22  ;;  %p2696_p11 = scmp.lt.u32.totalorder %s2692_s22, %s3984_s5 }
 0x2bc   :  { %p2698_p12 = pnand %p2696_p11, %p2693_p10 }
 0x2be   :  { %2701 = shalt.err (!%p2698_p12)
}
 0x2bf   :  { %2399 = dma.vmem_to_hbm [thread:$0]  %s2397_s17, 16, %s3984_s5, [#allocation5]  }
 0x2c0   :  { %2704 = dma.done.wait [#allocation5], 16  }
 0x2c1   :  { %2705 = vsyncadd [#allocation5], 4294967280 }
 0x2c2   :  { %2403 = vsyncpa [#allocation5], 1 }
 0x2c3   :  { %2404 = vsyncpa [#allocation6], 1 }

</bundles_post_ra>
